<compile_context>
chip_gen: v7x
topology: tpu7x:2x2x1
jax: 0.10.0
libtpu: 0.0.40
codegen_flags: <defaults>
</compile_context>

<pallas_src>
import functools

import jax
import jax.numpy as jnp
from jax import lax
from jax.experimental import pallas as pl
from jax.experimental.pallas import tpu as pltpu


def _ln(v, g, b, eps=1e-5):
    # v: (T, D); g/b: (1, D) -- biased variance, matching torch.nn.LayerNorm.
    mu = jnp.mean(v, axis=-1, keepdims=True)
    var = jnp.mean(jnp.square(v - mu), axis=-1, keepdims=True)
    return (v - mu) * lax.rsqrt(var + eps) * g + b


# --------------------------------------------------------------------------------------
# Pass 1: LN1 + fused K/V projections, written head-major (B, H, S, d_int).
# Grid: (batch, seq tile).
# --------------------------------------------------------------------------------------
def kv_proj_kernel(x_ref, ln1g_ref, ln1b_ref, wk_ref, bk_ref, wv_ref, bv_ref,
                   k_ref, v_ref, *, cdt):
    H = k_ref.shape[1]
    d_int = k_ref.shape[3]
    h = _ln(x_ref[0], ln1g_ref[...], ln1b_ref[...])           # (TS, D) f32
    hc = h.astype(cdt)
    k = jnp.dot(hc, wk_ref[...], preferred_element_type=jnp.float32) + bk_ref[...]
    v = jnp.dot(hc, wv_ref[...], preferred_element_type=jnp.float32) + bv_ref[...]
    for hd in range(H):                                       # small static H: unrolled
        lo = hd * d_int
        k_ref[0, hd] = k[:, lo:lo + d_int].astype(k_ref.dtype)
        v_ref[0, hd] = v[:, lo:lo + d_int].astype(v_ref.dtype)


# --------------------------------------------------------------------------------------
# Pass 2: LN1+Q (recomputed) -> causal flash attention -> folded output projection
#         -> residual -> LN2 -> FFN -> residual.  Grid: (batch, query tile).
# --------------------------------------------------------------------------------------
def attn_ffn_kernel(x_ref, k_ref, v_ref,
                    ln1g_ref, ln1b_ref, wq_ref, bq_ref,
                    wf_ref, bf_ref, ln2g_ref, ln2b_ref,
                    f1w_ref, f1b_ref, f2w_ref, f2b_ref,
                    o_ref, ctx_ref, *, cdt, approx_recip):
    x = x_ref[0]                                              # (TQ, D) f32
    TQ = x.shape[0]
    H = k_ref.shape[1]
    d_int = k_ref.shape[3]
    scale = float(d_int) ** -0.5
    qi = pl.program_id(1)

    # LN1 + Q projection recomputed per query tile (removes the Q HBM round-trip).
    h1 = _ln(x, ln1g_ref[...], ln1b_ref[...])
    h1c = h1.astype(cdt)

    row = qi * TQ + lax.broadcasted_iota(jnp.int32, (TQ, TQ), 0)
    col = lax.broadcasted_iota(jnp.int32, (TQ, TQ), 1)

    for hd in range(H):                                       # small static H: unrolled
        qh = (jnp.dot(h1c, wq_ref[hd], preferred_element_type=jnp.float32)
              + bq_ref[hd]).astype(cdt)                       # (TQ, d_int)

        def kv_step(kvi, carry):
            m_i, l_i, acc = carry
            kv0 = pl.multiple_of(kvi * TQ, TQ)
            kh = k_ref[0, hd, pl.ds(kv0, TQ), :]              # (TQ, d_int), contiguous head block
            vh = v_ref[0, hd, pl.ds(kv0, TQ), :]
            # contract last dims (no K transpose)
            s = lax.dot_general(qh, kh, (((1,), (1,)), ((), ())),
                                preferred_element_type=jnp.float32) * scale
            # additive causal bias, kept in f32 (finite -1e30, underflows to exact 0 in exp)
            s = s + jnp.where(kv0 + col <= row, 0.0, -1e30).astype(jnp.float32)
            m_new = jnp.maximum(m_i, jnp.max(s, axis=-1, keepdims=True))
            alpha = jnp.exp(m_i - m_new)
            p = jnp.exp(s - m_new)                            # f32 exp (safe on v5e too)
            l_new = alpha * l_i + jnp.sum(p, axis=-1, keepdims=True)
            acc_new = alpha * acc + jnp.dot(p.astype(cdt), vh,
                                            preferred_element_type=jnp.float32)
            return m_new, l_new, acc_new

        m0 = jnp.full((TQ, 1), -1e30, jnp.float32)
        l0 = jnp.zeros((TQ, 1), jnp.float32)
        a0 = jnp.zeros((TQ, d_int), jnp.float32)
        # Causality: only K/V chunks 0..qi are ever touched (~2x fewer attention FLOPs).
        m_i, l_i, acc = lax.fori_loop(0, qi + 1, kv_step, (m0, l0, a0))
        # NOTE: approx reciprocal (EUP) only on the bf16 path -> ~1e-2-level softmax error,
        # well inside the bf16 tolerance; the f32 path stays exact.
        ctx_ref[:, hd * d_int:(hd + 1) * d_int] = acc * pl.reciprocal(l_i, approx=approx_recip)

    # One wide output projection: (TQ, H*d_int) @ (H*d_int, D), w0 folded into linear1.
    mha = jnp.dot(ctx_ref[...].astype(cdt), wf_ref[...],
                  preferred_element_type=jnp.float32) + bf_ref[...]

    x1 = x + mha                                              # residual 1
    h2 = _ln(x1, ln2g_ref[...], ln2b_ref[...])
    ff = jnp.dot(h2.astype(cdt), f1w_ref[...], preferred_element_type=jnp.float32) + f1b_ref[...]
    ff = jnp.maximum(ff, 0.0)
    ff = jnp.dot(ff.astype(cdt), f2w_ref[...], preferred_element_type=jnp.float32) + f2b_ref[...]
    o_ref[0] = (x1 + ff).astype(o_ref.dtype)                  # residual 2


# --------------------------------------------------------------------------------------
# Host-side wrapper
# --------------------------------------------------------------------------------------
def _vmem_capacity_bytes():
    try:
        info = pltpu.get_tpu_info()
        v = getattr(info, "vmem_capacity_bytes", None)
        if v:
            return int(v)
    except Exception:
        pass
    return 128 * 1024 * 1024


def _pick_tile(S, target):
    """Largest tile <= target dividing S, preferring multiples of 128, then 16, then 8."""
    if S <= target:
        return S
    for step in (128, 16, 8):
        best = None
        for t in range(step, target + 1, step):
            if S % t == 0:
                best = t
        if best is not None:
            return best
    return S


def _forward(x, params, *, use_bf16, seq_tile, single_buffer):
    B, S, D = x.shape
    H, _, d_int = params["kw"].shape
    HD = H * d_int
    Dh = D // H
    D4 = 4 * D
    cdt = jnp.bfloat16 if use_bf16 else jnp.float32

    # generation-aware VMEM budget and tile target (v7x: 64 MiB VMEM -> 48 MiB limit, tile 256;
    # v5e/v6e: 128 MiB -> ~96 MiB limit, tile 512)
    vmem = _vmem_capacity_bytes()
    vmem_limit = min(vmem * 3 // 4, 100 * 1024 * 1024)
    tile_target = 256 if vmem <= 64 * 1024 * 1024 else 512

    # ---------------- host-side weight repacking (offline fusion / fold) ----------------
    def fuse_w(w):  # (H, D, d) -> (D, H*d)
        return jnp.transpose(w, (1, 0, 2)).reshape(D, HD)

    def fuse_b(b):  # (H, 1, d) -> (1, H*d)
        return jnp.transpose(b, (1, 0, 2)).reshape(1, HD)

    wk_f = fuse_w(params["kw"]).astype(cdt)
    wv_f = fuse_w(params["vw"]).astype(cdt)
    bk_f = fuse_b(params["kb"]).astype(jnp.float32)
    bv_f = fuse_b(params["vb"]).astype(jnp.float32)
    wq_h = params["qw"].astype(cdt)              # (H, D, d_int), used per-head in pass 2
    bq_h = params["qb"].astype(jnp.float32)      # (H, 1, d_int)

    # fold per-head w0 into linear1:  concat_h(ctx_h @ w0[h]) @ l1w == ctx_all @ wfold_flat
    l1w = params["l1w"]
    wfold = jnp.concatenate(
        [params["w0w"][h] @ l1w[h * Dh:(h + 1) * Dh, :] for h in range(H)], axis=0
    ).astype(cdt)                                                    # (HD, D), head-major rows
    w0b_cat = jnp.transpose(params["w0b"], (1, 0, 2)).reshape(1, D)  # (1, D)
    bfold = (w0b_cat @ l1w + params["l1b"]).astype(jnp.float32)      # (1, D)

    f1w_c = params["f1w"].astype(cdt)
    f2w_c = params["f2w"].astype(cdt)

    TS = int(seq_tile) if seq_tile is not None else _pick_tile(S, tile_target)
    assert S % TS == 0, f"sequence tile {TS} must divide sequence length {S}"
    TQ = TS
    nS = S // TS
    nQ = S // TQ

    def _spec(shape, index_map, single):
        if single:
            return pl.BlockSpec(shape, index_map, pipeline_mode=pl.Buffered(1))
        return pl.BlockSpec(shape, index_map)

    def const_spec(shape):  # grid-invariant: weights / biases / LN params
        n = len(shape)
        return _spec(shape, lambda b, i, _n=n: (0,) * _n, single_buffer)

    def batch_spec(shape):  # only changes with the batch grid axis (K/V slabs)
        n = len(shape) - 1
        return _spec(shape, lambda b, i, _n=n: (b,) + (0,) * _n, single_buffer)

    cparams = pltpu.CompilerParams(
        dimension_semantics=("parallel", "parallel"),
        vmem_limit_bytes=int(vmem_limit),
    )

    # --------------------------- pass 1: LN1 + fused K/V (head-major out) ---------------------------
    k, v = pl.pallas_call(
        functools.partial(kv_proj_kernel, cdt=cdt),
        out_shape=tuple(jax.ShapeDtypeStruct((B, H, S, d_int), cdt) for _ in range(2)),
        grid_spec=pltpu.PrefetchScalarGridSpec(
            num_scalar_prefetch=0,
            grid=(B, nS),
            in_specs=[
                pl.BlockSpec((1, TS, D), lambda b, s: (b, s, 0)),
                const_spec((1, D)), const_spec((1, D)),
                const_spec((D, HD)), const_spec((1, HD)),
                const_spec((D, HD)), const_spec((1, HD)),
            ],
            out_specs=tuple(
                pl.BlockSpec((1, H, TS, d_int), lambda b, s: (b, 0, s, 0)) for _ in range(2)
            ),
        ),
        compiler_params=cparams,
    )(x, params["ln1_g"], params["ln1_b"], wk_f, bk_f, wv_f, bv_f)

    # ------------------ pass 2: attention + residual + LN2 + FFN + residual ------------------
    out = pl.pallas_call(
        functools.partial(attn_ffn_kernel, cdt=cdt, approx_recip=use_bf16),
        out_shape=jax.ShapeDtypeStruct((B, S, D), x.dtype),
        grid_spec=pltpu.PrefetchScalarGridSpec(
            num_scalar_prefetch=0,
            grid=(B, nQ),
            in_specs=[
                pl.BlockSpec((1, TQ, D), lambda b, qi: (b, qi, 0)),    # x (residual / LN1+Q input)
                batch_spec((1, H, S, d_int)),                          # K per batch, head-major
                batch_spec((1, H, S, d_int)),                          # V per batch, head-major
                const_spec((1, D)), const_spec((1, D)),                # ln1 gamma, beta
                const_spec((H, D, d_int)), const_spec((H, 1, d_int)),  # per-head Q weight, bias
                const_spec((HD, D)), const_spec((1, D)),               # folded w0@l1 weight, bias
                const_spec((1, D)), const_spec((1, D)),                # ln2 gamma, beta
                const_spec((D, D4)), const_spec((1, D4)),              # ffwd fc1
                const_spec((D4, D)), const_spec((1, D)),               # ffwd fc2
            ],
            out_specs=pl.BlockSpec((1, TQ, D), lambda b, qi: (b, qi, 0)),
            scratch_shapes=[pltpu.VMEM((TQ, HD), jnp.float32)],        # per-head ctx assembly
        ),
        compiler_params=cparams,
    )(x, k, v,
      params["ln1_g"], params["ln1_b"], wq_h, bq_h,
      wfold, bfold, params["ln2_g"], params["ln2_b"],
      f1w_c, params["f1b"], f2w_c, params["f2b"])
    return out


def mha_transformer_layer(x, params, *, use_bf16=False, seq_tile=None,
                          single_buffer_invariants=True):
    """x: (B, S, D) float32.  params: dict from init_params (PyTorch-layout weights)."""
    try:
        return _forward(x, params, use_bf16=use_bf16, seq_tile=seq_tile,
                        single_buffer=single_buffer_invariants)
    except Exception:
        if not single_buffer_invariants:
            raise
        # pipeline_mode=pl.Buffered(1) unsupported on this JAX build: fall back to default
        # double-buffering (identical results, slightly higher VMEM use).
        return _forward(x, params, use_bf16=use_bf16, seq_tile=seq_tile,
                        single_buffer=False)


def init_params(key, seq_length, d_model, num_heads, d_internal):
    D, H, d_int = d_model, num_heads, d_internal
    Dh = D // H
    D4 = 4 * D
    ks = jax.random.split(key, 16)

    def init(k, shape, scale=0.05):
        return (scale * jax.random.normal(k, shape)).astype(jnp.float32)

    return {
        "ln1_g": jnp.ones((1, D), jnp.float32),
        "ln1_b": jnp.zeros((1, D), jnp.float32),
        "ln2_g": jnp.ones((1, D), jnp.float32),
        "ln2_b": jnp.zeros((1, D), jnp.float32),
        "kw": init(ks[0], (H, D, d_int)), "kb": init(ks[1], (H, 1, d_int)),
        "qw": init(ks[2], (H, D, d_int)), "qb": init(ks[3], (H, 1, d_int)),
        "vw": init(ks[4], (H, D, d_int)), "vb": init(ks[5], (H, 1, d_int)),
        "w0w": init(ks[6], (H, d_int, Dh)), "w0b": init(ks[7], (H, 1, Dh)),
        "l1w": init(ks[8], (D, D)), "l1b": init(ks[9], (1, D)),
        "f1w": init(ks[10], (D, D4)), "f1b": init(ks[11], (1, D4)),
        "f2w": init(ks[12], (D4, D)), "f2b": init(ks[13], (1, D)),
    }


def reference_forward(x, p):
    """Pure-JAX reference mirroring the PyTorch module, for verification."""
    def ln(v, g, b, eps=1e-5):
        mu = jnp.mean(v, axis=-1, keepdims=True)
        var = jnp.mean((v - mu) ** 2, axis=-1, keepdims=True)
        return (v - mu) / jnp.sqrt(var + eps) * g + b

    B, S, D = x.shape
    H, _, d_int = p["kw"].shape
    h = ln(x, p["ln1_g"], p["ln1_b"])
    tril = jnp.tril(jnp.ones((S, S)))
    heads = []
    for hd in range(H):
        K = h @ p["kw"][hd] + p["kb"][hd]
        Q = h @ p["qw"][hd] + p["qb"][hd]
        V = h @ p["vw"][hd] + p["vb"][hd]
        w = jnp.einsum("bqd,bkd->bqk", Q, K) * (d_int ** -0.5)
        w = jnp.where(tril == 0, -jnp.inf, w)
        a = jax.nn.softmax(w, axis=-1)
        heads.append(jnp.einsum("bqk,bkd->bqd", a, V) @ p["w0w"][hd] + p["w0b"][hd])
    mha = jnp.concatenate(heads, axis=-1) @ p["l1w"] + p["l1b"]
    x1 = mha + x
    h2 = ln(x1, p["ln2_g"], p["ln2_b"])
    ff = jnp.maximum(h2 @ p["f1w"] + p["f1b"], 0.0) @ p["f2w"] + p["f2b"]
    return x1 + ff


if __name__ == "__main__":
    B, S, D, H, d_int = 2, 8, 32, 4, 16
    key = jax.random.PRNGKey(0)
    kx, kp = jax.random.split(key)
    x = jax.random.normal(kx, (B, S, D), dtype=jnp.float32)
    params = init_params(kp, S, D, H, d_int)

    ref = jax.block_until_ready(reference_forward(x, params))

    # full-precision path (reference accuracy)
    out_f32 = jax.block_until_ready(mha_transformer_layer(x, params, use_bf16=False))
    assert out_f32.shape == (B, S, D)
    assert jnp.allclose(out_f32, ref, rtol=1e-4, atol=1e-4), "f32 kernel mismatch vs reference"

    # bf16 fast path (v6e/v7x MXU-friendly operands, f32 accumulation + f32 softmax math)
    out_bf16 = jax.block_until_ready(mha_transformer_layer(x, params, use_bf16=True))
    assert jnp.allclose(out_bf16, ref, rtol=2e-2, atol=2e-2), "bf16 kernel mismatch vs reference"

    print("KERNEL_OK")
</pallas_src>

<mosaic_0001>
module attributes {stable_mosaic.version = 11 : i64} {
  func.func @kv_proj_kernel(%arg0: i32, %arg1: i32, %arg2: memref<1x8x32xf32, #tpu.memory_space<vmem>>, %arg3: memref<1x32xf32, #tpu.memory_space<vmem>>, %arg4: memref<1x32xf32, #tpu.memory_space<vmem>>, %arg5: memref<32x64xf32, #tpu.memory_space<vmem>>, %arg6: memref<1x64xf32, #tpu.memory_space<vmem>>, %arg7: memref<32x64xf32, #tpu.memory_space<vmem>>, %arg8: memref<1x64xf32, #tpu.memory_space<vmem>>, %arg9: memref<1x4x8x16xf32, #tpu.memory_space<vmem>>, %arg10: memref<1x4x8x16xf32, #tpu.memory_space<vmem>>) attributes {dimension_semantics = [#tpu.dimension_semantics<parallel>, #tpu.dimension_semantics<parallel>], iteration_bounds = array<i64: 2, 1>, scalar_prefetch = 0 : i64, scratch_operands = 0 : i64, tpu.core_type = #tpu.core_type<tc>, window_params = [{transform_indices = @transform_0, window_bounds = array<i64: 1, 8, 32>}, {pipeline_mode = #tpu.pipeline_mode<synchronous>, transform_indices = @transform_1, window_bounds = array<i64: 1, 32>}, {pipeline_mode = #tpu.pipeline_mode<synchronous>, transform_indices = @transform_2, window_bounds = array<i64: 1, 32>}, {pipeline_mode = #tpu.pipeline_mode<synchronous>, transform_indices = @transform_3, window_bounds = array<i64: 32, 64>}, {pipeline_mode = #tpu.pipeline_mode<synchronous>, transform_indices = @transform_4, window_bounds = array<i64: 1, 64>}, {pipeline_mode = #tpu.pipeline_mode<synchronous>, transform_indices = @transform_5, window_bounds = array<i64: 32, 64>}, {pipeline_mode = #tpu.pipeline_mode<synchronous>, transform_indices = @transform_6, window_bounds = array<i64: 1, 64>}, {transform_indices = @transform_7, window_bounds = array<i64: 1, 4, 8, 16>}, {transform_indices = @transform_8, window_bounds = array<i64: 1, 4, 8, 16>}]} {
    %c0 = arith.constant 0 : index
    %c0_0 = arith.constant 0 : index
    %c0_1 = arith.constant 0 : index
    %0 = vector.load %arg2[%c0, %c0_0, %c0_1] : memref<1x8x32xf32, #tpu.memory_space<vmem>>, vector<1x8x32xf32>
    %1 = vector.shape_cast %0 : vector<1x8x32xf32> to vector<8x32xf32>
    %c0_2 = arith.constant 0 : index
    %c0_3 = arith.constant 0 : index
    %2 = vector.load %arg3[%c0_2, %c0_3] : memref<1x32xf32, #tpu.memory_space<vmem>>, vector<1x32xf32>
    %c0_4 = arith.constant 0 : index
    %c0_5 = arith.constant 0 : index
    %3 = vector.load %arg4[%c0_4, %c0_5] : memref<1x32xf32, #tpu.memory_space<vmem>>, vector<1x32xf32>
    %cst = arith.constant dense<0.000000e+00> : vector<8xf32>
    %4 = vector.multi_reduction <add>, %1, %cst [1] : vector<8x32xf32> to vector<8xf32>
    %5 = vector.shape_cast %4 : vector<8xf32> to vector<8x1xf32>
    %cst_6 = arith.constant 3.200000e+01 : f32
    %6 = vector.broadcast %cst_6 : f32 to vector<8x1xf32>
    %7 = arith.divf %5, %6 : vector<8x1xf32>
    %8 = vector.broadcast %7 : vector<8x1xf32> to vector<8x32xf32>
    %9 = arith.subf %1, %8 : vector<8x32xf32>
    %10 = arith.mulf %9, %9 : vector<8x32xf32>
    %cst_7 = arith.constant dense<0.000000e+00> : vector<8xf32>
    %11 = vector.multi_reduction <add>, %10, %cst_7 [1] : vector<8x32xf32> to vector<8xf32>
    %12 = vector.shape_cast %11 : vector<8xf32> to vector<8x1xf32>
    %cst_8 = arith.constant 3.200000e+01 : f32
    %13 = vector.broadcast %cst_8 : f32 to vector<8x1xf32>
    %14 = arith.divf %12, %13 : vector<8x1xf32>
    %15 = vector.broadcast %7 : vector<8x1xf32> to vector<8x32xf32>
    %16 = arith.subf %1, %15 : vector<8x32xf32>
    %cst_9 = arith.constant 9.99999974E-6 : f32
    %17 = vector.broadcast %cst_9 : f32 to vector<8x1xf32>
    %18 = arith.addf %14, %17 : vector<8x1xf32>
    %19 = math.rsqrt %18 : vector<8x1xf32>
    %20 = vector.broadcast %19 : vector<8x1xf32> to vector<8x32xf32>
    %21 = arith.mulf %16, %20 : vector<8x32xf32>
    %22 = vector.broadcast %2 : vector<1x32xf32> to vector<8x32xf32>
    %23 = arith.mulf %21, %22 : vector<8x32xf32>
    %24 = vector.broadcast %3 : vector<1x32xf32> to vector<8x32xf32>
    %25 = arith.addf %23, %24 : vector<8x32xf32>
    %c0_10 = arith.constant 0 : index
    %c0_11 = arith.constant 0 : index
    %26 = vector.load %arg5[%c0_10, %c0_11] : memref<32x64xf32, #tpu.memory_space<vmem>>, vector<32x64xf32>
    %cst_12 = arith.constant dense<0.000000e+00> : vector<8x64xf32>
    %27 = tpu.matmul %25, %26, %cst_12 {dimension_numbers = #tpu.dot_dimension_numbers<[1], [0], [0], [1], [0, 0, 1, 1], [], []>} : vector<8x32xf32>, vector<32x64xf32>, vector<8x64xf32> -> vector<8x64xf32>
    %c0_13 = arith.constant 0 : index
    %c0_14 = arith.constant 0 : index
    %28 = vector.load %arg6[%c0_13, %c0_14] : memref<1x64xf32, #tpu.memory_space<vmem>>, vector<1x64xf32>
    %29 = vector.broadcast %28 : vector<1x64xf32> to vector<8x64xf32>
    %30 = arith.addf %27, %29 : vector<8x64xf32>
    %c0_15 = arith.constant 0 : index
    %c0_16 = arith.constant 0 : index
    %31 = vector.load %arg7[%c0_15, %c0_16] : memref<32x64xf32, #tpu.memory_space<vmem>>, vector<32x64xf32>
    %cst_17 = arith.constant dense<0.000000e+00> : vector<8x64xf32>
    %32 = tpu.matmul %25, %31, %cst_17 {dimension_numbers = #tpu.dot_dimension_numbers<[1], [0], [0], [1], [0, 0, 1, 1], [], []>} : vector<8x32xf32>, vector<32x64xf32>, vector<8x64xf32> -> vector<8x64xf32>
    %c0_18 = arith.constant 0 : index
    %c0_19 = arith.constant 0 : index
    %33 = vector.load %arg8[%c0_18, %c0_19] : memref<1x64xf32, #tpu.memory_space<vmem>>, vector<1x64xf32>
    %34 = vector.broadcast %33 : vector<1x64xf32> to vector<8x64xf32>
    %35 = arith.addf %32, %34 : vector<8x64xf32>
    %36 = vector.extract_strided_slice %30 {offsets = [0, 0], sizes = [8, 16], strides = [1, 1]} : vector<8x64xf32> to vector<8x16xf32>
    %c0_20 = arith.constant 0 : index
    %c0_21 = arith.constant 0 : index
    %c0_22 = arith.constant 0 : index
    %c0_23 = arith.constant 0 : index
    %37 = vector.load %arg9[%c0_20, %c0_21, %c0_22, %c0_23] : memref<1x4x8x16xf32, #tpu.memory_space<vmem>>, vector<1x1x8x16xf32>
    %38 = vector.shape_cast %37 : vector<1x1x8x16xf32> to vector<8x16xf32>
    %39 = vector.shape_cast %36 : vector<8x16xf32> to vector<1x1x8x16xf32>
    tpu.vector_store %arg9[%c0_20, %c0_21, %c0_22, %c0_23], %39 {strides = array<i32>} : memref<1x4x8x16xf32, #tpu.memory_space<vmem>>, vector<1x1x8x16xf32>,
    %40 = vector.extract_strided_slice %35 {offsets = [0, 0], sizes = [8, 16], strides = [1, 1]} : vector<8x64xf32> to vector<8x16xf32>
    %c0_24 = arith.constant 0 : index
    %c0_25 = arith.constant 0 : index
    %c0_26 = arith.constant 0 : index
    %c0_27 = arith.constant 0 : index
    %41 = vector.load %arg10[%c0_24, %c0_25, %c0_26, %c0_27] : memref<1x4x8x16xf32, #tpu.memory_space<vmem>>, vector<1x1x8x16xf32>
    %42 = vector.shape_cast %41 : vector<1x1x8x16xf32> to vector<8x16xf32>
    %43 = vector.shape_cast %40 : vector<8x16xf32> to vector<1x1x8x16xf32>
    tpu.vector_store %arg10[%c0_24, %c0_25, %c0_26, %c0_27], %43 {strides = array<i32>} : memref<1x4x8x16xf32, #tpu.memory_space<vmem>>, vector<1x1x8x16xf32>,
    %44 = vector.extract_strided_slice %30 {offsets = [0, 16], sizes = [8, 16], strides = [1, 1]} : vector<8x64xf32> to vector<8x16xf32>
    %c0_28 = arith.constant 0 : index
    %c1 = arith.constant 1 : index
    %c0_29 = arith.constant 0 : index
    %c0_30 = arith.constant 0 : index
    %45 = vector.load %arg9[%c0_28, %c1, %c0_29, %c0_30] : memref<1x4x8x16xf32, #tpu.memory_space<vmem>>, vector<1x1x8x16xf32>
    %46 = vector.shape_cast %45 : vector<1x1x8x16xf32> to vector<8x16xf32>
    %47 = vector.shape_cast %44 : vector<8x16xf32> to vector<1x1x8x16xf32>
    tpu.vector_store %arg9[%c0_28, %c1, %c0_29, %c0_30], %47 {strides = array<i32>} : memref<1x4x8x16xf32, #tpu.memory_space<vmem>>, vector<1x1x8x16xf32>,
    %48 = vector.extract_strided_slice %35 {offsets = [0, 16], sizes = [8, 16], strides = [1, 1]} : vector<8x64xf32> to vector<8x16xf32>
    %c0_31 = arith.constant 0 : index
    %c1_32 = arith.constant 1 : index
    %c0_33 = arith.constant 0 : index
    %c0_34 = arith.constant 0 : index
    %49 = vector.load %arg10[%c0_31, %c1_32, %c0_33, %c0_34] : memref<1x4x8x16xf32, #tpu.memory_space<vmem>>, vector<1x1x8x16xf32>
    %50 = vector.shape_cast %49 : vector<1x1x8x16xf32> to vector<8x16xf32>
    %51 = vector.shape_cast %48 : vector<8x16xf32> to vector<1x1x8x16xf32>
    tpu.vector_store %arg10[%c0_31, %c1_32, %c0_33, %c0_34], %51 {strides = array<i32>} : memref<1x4x8x16xf32, #tpu.memory_space<vmem>>, vector<1x1x8x16xf32>,
    %52 = vector.extract_strided_slice %30 {offsets = [0, 32], sizes = [8, 16], strides = [1, 1]} : vector<8x64xf32> to vector<8x16xf32>
    %c0_35 = arith.constant 0 : index
    %c2 = arith.constant 2 : index
    %c0_36 = arith.constant 0 : index
    %c0_37 = arith.constant 0 : index
    %53 = vector.load %arg9[%c0_35, %c2, %c0_36, %c0_37] : memref<1x4x8x16xf32, #tpu.memory_space<vmem>>, vector<1x1x8x16xf32>
    %54 = vector.shape_cast %53 : vector<1x1x8x16xf32> to vector<8x16xf32>
    %55 = vector.shape_cast %52 : vector<8x16xf32> to vector<1x1x8x16xf32>
    tpu.vector_store %arg9[%c0_35, %c2, %c0_36, %c0_37], %55 {strides = array<i32>} : memref<1x4x8x16xf32, #tpu.memory_space<vmem>>, vector<1x1x8x16xf32>,
    %56 = vector.extract_strided_slice %35 {offsets = [0, 32], sizes = [8, 16], strides = [1, 1]} : vector<8x64xf32> to vector<8x16xf32>
    %c0_38 = arith.constant 0 : index
    %c2_39 = arith.constant 2 : index
    %c0_40 = arith.constant 0 : index
    %c0_41 = arith.constant 0 : index
    %57 = vector.load %arg10[%c0_38, %c2_39, %c0_40, %c0_41] : memref<1x4x8x16xf32, #tpu.memory_space<vmem>>, vector<1x1x8x16xf32>
    %58 = vector.shape_cast %57 : vector<1x1x8x16xf32> to vector<8x16xf32>
    %59 = vector.shape_cast %56 : vector<8x16xf32> to vector<1x1x8x16xf32>
    tpu.vector_store %arg10[%c0_38, %c2_39, %c0_40, %c0_41], %59 {strides = array<i32>} : memref<1x4x8x16xf32, #tpu.memory_space<vmem>>, vector<1x1x8x16xf32>,
    %60 = vector.extract_strided_slice %30 {offsets = [0, 48], sizes = [8, 16], strides = [1, 1]} : vector<8x64xf32> to vector<8x16xf32>
    %c0_42 = arith.constant 0 : index
    %c3 = arith.constant 3 : index
    %c0_43 = arith.constant 0 : index
    %c0_44 = arith.constant 0 : index
    %61 = vector.load %arg9[%c0_42, %c3, %c0_43, %c0_44] : memref<1x4x8x16xf32, #tpu.memory_space<vmem>>, vector<1x1x8x16xf32>
    %62 = vector.shape_cast %61 : vector<1x1x8x16xf32> to vector<8x16xf32>
    %63 = vector.shape_cast %60 : vector<8x16xf32> to vector<1x1x8x16xf32>
    tpu.vector_store %arg9[%c0_42, %c3, %c0_43, %c0_44], %63 {strides = array<i32>} : memref<1x4x8x16xf32, #tpu.memory_space<vmem>>, vector<1x1x8x16xf32>,
    %64 = vector.extract_strided_slice %35 {offsets = [0, 48], sizes = [8, 16], strides = [1, 1]} : vector<8x64xf32> to vector<8x16xf32>
    %c0_45 = arith.constant 0 : index
    %c3_46 = arith.constant 3 : index
    %c0_47 = arith.constant 0 : index
    %c0_48 = arith.constant 0 : index
    %65 = vector.load %arg10[%c0_45, %c3_46, %c0_47, %c0_48] : memref<1x4x8x16xf32, #tpu.memory_space<vmem>>, vector<1x1x8x16xf32>
    %66 = vector.shape_cast %65 : vector<1x1x8x16xf32> to vector<8x16xf32>
    %67 = vector.shape_cast %64 : vector<8x16xf32> to vector<1x1x8x16xf32>
    tpu.vector_store %arg10[%c0_45, %c3_46, %c0_47, %c0_48], %67 {strides = array<i32>} : memref<1x4x8x16xf32, #tpu.memory_space<vmem>>, vector<1x1x8x16xf32>,
    return
  }
  func.func @transform_0(%arg0: i32, %arg1: i32) -> (i32, i32, i32) {
    %c0_i32 = arith.constant 0 : i32
    %c0_i32_0 = arith.constant 0 : i32
    return %arg0, %arg1, %c0_i32 : i32, i32, i32
  }
  func.func @transform_1(%arg0: i32, %arg1: i32) -> (i32, i32) {
    %c0_i32 = arith.constant 0 : i32
    %c0_i32_0 = arith.constant 0 : i32
    %c0_i32_1 = arith.constant 0 : i32
    return %c0_i32, %c0_i32_0 : i32, i32
  }
  func.func @transform_2(%arg0: i32, %arg1: i32) -> (i32, i32) {
    %c0_i32 = arith.constant 0 : i32
    %c0_i32_0 = arith.constant 0 : i32
    %c0_i32_1 = arith.constant 0 : i32
    return %c0_i32, %c0_i32_0 : i32, i32
  }
  func.func @transform_3(%arg0: i32, %arg1: i32) -> (i32, i32) {
    %c0_i32 = arith.constant 0 : i32
    %c0_i32_0 = arith.constant 0 : i32
    %c0_i32_1 = arith.constant 0 : i32
    return %c0_i32, %c0_i32_0 : i32, i32
  }
  func.func @transform_4(%arg0: i32, %arg1: i32) -> (i32, i32) {
    %c0_i32 = arith.constant 0 : i32
    %c0_i32_0 = arith.constant 0 : i32
    %c0_i32_1 = arith.constant 0 : i32
    return %c0_i32, %c0_i32_0 : i32, i32
  }
  func.func @transform_5(%arg0: i32, %arg1: i32) -> (i32, i32) {
    %c0_i32 = arith.constant 0 : i32
    %c0_i32_0 = arith.constant 0 : i32
    %c0_i32_1 = arith.constant 0 : i32
    return %c0_i32, %c0_i32_0 : i32, i32
  }
  func.func @transform_6(%arg0: i32, %arg1: i32) -> (i32, i32) {
    %c0_i32 = arith.constant 0 : i32
    %c0_i32_0 = arith.constant 0 : i32
    %c0_i32_1 = arith.constant 0 : i32
    return %c0_i32, %c0_i32_0 : i32, i32
  }
  func.func @transform_7(%arg0: i32, %arg1: i32) -> (i32, i32, i32, i32) {
    %c0_i32 = arith.constant 0 : i32
    %c0_i32_0 = arith.constant 0 : i32
    %c0_i32_1 = arith.constant 0 : i32
    return %arg0, %c0_i32, %arg1, %c0_i32_0 : i32, i32, i32, i32
  }
  func.func @transform_8(%arg0: i32, %arg1: i32) -> (i32, i32, i32, i32) {
    %c0_i32 = arith.constant 0 : i32
    %c0_i32_0 = arith.constant 0 : i32
    %c0_i32_1 = arith.constant 0 : i32
    return %arg0, %c0_i32, %arg1, %c0_i32_0 : i32, i32, i32, i32
  }
}

module attributes {stable_mosaic.version = 11 : i64} {
  func.func @kv_proj_kernel(%arg0: i32, %arg1: i32, %arg2: memref<1x8x32xf32, #tpu.memory_space<vmem>>, %arg3: memref<1x32xf32, #tpu.memory_space<vmem>>, %arg4: memref<1x32xf32, #tpu.memory_space<vmem>>, %arg5: memref<32x64xf32, #tpu.memory_space<vmem>>, %arg6: memref<1x64xf32, #tpu.memory_space<vmem>>, %arg7: memref<32x64xf32, #tpu.memory_space<vmem>>, %arg8: memref<1x64xf32, #tpu.memory_space<vmem>>, %arg9: memref<1x4x8x16xf32, #tpu.memory_space<vmem>>, %arg10: memref<1x4x8x16xf32, #tpu.memory_space<vmem>>) attributes {dimension_semantics = [#tpu.dimension_semantics<parallel>, #tpu.dimension_semantics<parallel>], iteration_bounds = array<i64: 2, 1>, scalar_prefetch = 0 : i64, scratch_operands = 0 : i64, tpu.core_type = #tpu.core_type<tc>, window_params = [{transform_indices = @transform_0, window_bounds = array<i64: 1, 8, 32>}, {pipeline_mode = #tpu.pipeline_mode<synchronous>, transform_indices = @transform_1, window_bounds = array<i64: 1, 32>}, {pipeline_mode = #tpu.pipeline_mode<synchronous>, transform_indices = @transform_2, window_bounds = array<i64: 1, 32>}, {pipeline_mode = #tpu.pipeline_mode<synchronous>, transform_indices = @transform_3, window_bounds = array<i64: 32, 64>}, {pipeline_mode = #tpu.pipeline_mode<synchronous>, transform_indices = @transform_4, window_bounds = array<i64: 1, 64>}, {pipeline_mode = #tpu.pipeline_mode<synchronous>, transform_indices = @transform_5, window_bounds = array<i64: 32, 64>}, {pipeline_mode = #tpu.pipeline_mode<synchronous>, transform_indices = @transform_6, window_bounds = array<i64: 1, 64>}, {transform_indices = @transform_7, window_bounds = array<i64: 1, 4, 8, 16>}, {transform_indices = @transform_8, window_bounds = array<i64: 1, 4, 8, 16>}]} {
    %c0 = arith.constant 0 : index
    %c0_0 = arith.constant 0 : index
    %c0_1 = arith.constant 0 : index
    %0 = vector.load %arg2[%c0, %c0_0, %c0_1] : memref<1x8x32xf32, #tpu.memory_space<vmem>>, vector<1x8x32xf32>
    %1 = vector.shape_cast %0 : vector<1x8x32xf32> to vector<8x32xf32>
    %c0_2 = arith.constant 0 : index
    %c0_3 = arith.constant 0 : index
    %2 = vector.load %arg3[%c0_2, %c0_3] : memref<1x32xf32, #tpu.memory_space<vmem>>, vector<1x32xf32>
    %c0_4 = arith.constant 0 : index
    %c0_5 = arith.constant 0 : index
    %3 = vector.load %arg4[%c0_4, %c0_5] : memref<1x32xf32, #tpu.memory_space<vmem>>, vector<1x32xf32>
    %cst = arith.constant dense<0.000000e+00> : vector<8xf32>
    %4 = vector.multi_reduction <add>, %1, %cst [1] : vector<8x32xf32> to vector<8xf32>
    %5 = vector.shape_cast %4 : vector<8xf32> to vector<8x1xf32>
    %cst_6 = arith.constant 3.200000e+01 : f32
    %6 = vector.broadcast %cst_6 : f32 to vector<8x1xf32>
    %7 = arith.divf %5, %6 : vector<8x1xf32>
    %8 = vector.broadcast %7 : vector<8x1xf32> to vector<8x32xf32>
    %9 = arith.subf %1, %8 : vector<8x32xf32>
    %10 = arith.mulf %9, %9 : vector<8x32xf32>
    %cst_7 = arith.constant dense<0.000000e+00> : vector<8xf32>
    %11 = vector.multi_reduction <add>, %10, %cst_7 [1] : vector<8x32xf32> to vector<8xf32>
    %12 = vector.shape_cast %11 : vector<8xf32> to vector<8x1xf32>
    %cst_8 = arith.constant 3.200000e+01 : f32
    %13 = vector.broadcast %cst_8 : f32 to vector<8x1xf32>
    %14 = arith.divf %12, %13 : vector<8x1xf32>
    %15 = vector.broadcast %7 : vector<8x1xf32> to vector<8x32xf32>
    %16 = arith.subf %1, %15 : vector<8x32xf32>
    %cst_9 = arith.constant 9.99999974E-6 : f32
    %17 = vector.broadcast %cst_9 : f32 to vector<8x1xf32>
    %18 = arith.addf %14, %17 : vector<8x1xf32>
    %19 = math.rsqrt %18 : vector<8x1xf32>
    %20 = vector.broadcast %19 : vector<8x1xf32> to vector<8x32xf32>
    %21 = arith.mulf %16, %20 : vector<8x32xf32>
    %22 = vector.broadcast %2 : vector<1x32xf32> to vector<8x32xf32>
    %23 = arith.mulf %21, %22 : vector<8x32xf32>
    %24 = vector.broadcast %3 : vector<1x32xf32> to vector<8x32xf32>
    %25 = arith.addf %23, %24 : vector<8x32xf32>
    %c0_10 = arith.constant 0 : index
    %c0_11 = arith.constant 0 : index
    %26 = vector.load %arg5[%c0_10, %c0_11] : memref<32x64xf32, #tpu.memory_space<vmem>>, vector<32x64xf32>
    %cst_12 = arith.constant dense<0.000000e+00> : vector<8x64xf32>
    %27 = tpu.matmul %25, %26, %cst_12 {dimension_numbers = #tpu.dot_dimension_numbers<[1], [0], [0], [1], [0, 0, 1, 1], [], []>} : vector<8x32xf32>, vector<32x64xf32>, vector<8x64xf32> -> vector<8x64xf32>
    %c0_13 = arith.constant 0 : index
    %c0_14 = arith.constant 0 : index
    %28 = vector.load %arg6[%c0_13, %c0_14] : memref<1x64xf32, #tpu.memory_space<vmem>>, vector<1x64xf32>
    %29 = vector.broadcast %28 : vector<1x64xf32> to vector<8x64xf32>
    %30 = arith.addf %27, %29 : vector<8x64xf32>
    %c0_15 = arith.constant 0 : index
    %c0_16 = arith.constant 0 : index
    %31 = vector.load %arg7[%c0_15, %c0_16] : memref<32x64xf32, #tpu.memory_space<vmem>>, vector<32x64xf32>
    %cst_17 = arith.constant dense<0.000000e+00> : vector<8x64xf32>
    %32 = tpu.matmul %25, %31, %cst_17 {dimension_numbers = #tpu.dot_dimension_numbers<[1], [0], [0], [1], [0, 0, 1, 1], [], []>} : vector<8x32xf32>, vector<32x64xf32>, vector<8x64xf32> -> vector<8x64xf32>
    %c0_18 = arith.constant 0 : index
    %c0_19 = arith.constant 0 : index
    %33 = vector.load %arg8[%c0_18, %c0_19] : memref<1x64xf32, #tpu.memory_space<vmem>>, vector<1x64xf32>
    %34 = vector.broadcast %33 : vector<1x64xf32> to vector<8x64xf32>
    %35 = arith.addf %32, %34 : vector<8x64xf32>
    %36 = vector.extract_strided_slice %30 {offsets = [0, 0], sizes = [8, 16], strides = [1, 1]} : vector<8x64xf32> to vector<8x16xf32>
    %c0_20 = arith.constant 0 : index
    %c0_21 = arith.constant 0 : index
    %c0_22 = arith.constant 0 : index
    %c0_23 = arith.constant 0 : index
    %37 = vector.load %arg9[%c0_20, %c0_21, %c0_22, %c0_23] : memref<1x4x8x16xf32, #tpu.memory_space<vmem>>, vector<1x1x8x16xf32>
    %38 = vector.shape_cast %37 : vector<1x1x8x16xf32> to vector<8x16xf32>
    %39 = vector.shape_cast %36 : vector<8x16xf32> to vector<1x1x8x16xf32>
    tpu.vector_store %arg9[%c0_20, %c0_21, %c0_22, %c0_23], %39 {strides = array<i32>} : memref<1x4x8x16xf32, #tpu.memory_space<vmem>>, vector<1x1x8x16xf32>,
    %40 = vector.extract_strided_slice %35 {offsets = [0, 0], sizes = [8, 16], strides = [1, 1]} : vector<8x64xf32> to vector<8x16xf32>
    %c0_24 = arith.constant 0 : index
    %c0_25 = arith.constant 0 : index
    %c0_26 = arith.constant 0 : index
    %c0_27 = arith.constant 0 : index
    %41 = vector.load %arg10[%c0_24, %c0_25, %c0_26, %c0_27] : memref<1x4x8x16xf32, #tpu.memory_space<vmem>>, vector<1x1x8x16xf32>
    %42 = vector.shape_cast %41 : vector<1x1x8x16xf32> to vector<8x16xf32>
    %43 = vector.shape_cast %40 : vector<8x16xf32> to vector<1x1x8x16xf32>
    tpu.vector_store %arg10[%c0_24, %c0_25, %c0_26, %c0_27], %43 {strides = array<i32>} : memref<1x4x8x16xf32, #tpu.memory_space<vmem>>, vector<1x1x8x16xf32>,
    %44 = vector.extract_strided_slice %30 {offsets = [0, 16], sizes = [8, 16], strides = [1, 1]} : vector<8x64xf32> to vector<8x16xf32>
    %c0_28 = arith.constant 0 : index
    %c1 = arith.constant 1 : index
    %c0_29 = arith.constant 0 : index
    %c0_30 = arith.constant 0 : index
    %45 = vector.load %arg9[%c0_28, %c1, %c0_29, %c0_30] : memref<1x4x8x16xf32, #tpu.memory_space<vmem>>, vector<1x1x8x16xf32>
    %46 = vector.shape_cast %45 : vector<1x1x8x16xf32> to vector<8x16xf32>
    %47 = vector.shape_cast %44 : vector<8x16xf32> to vector<1x1x8x16xf32>
    tpu.vector_store %arg9[%c0_28, %c1, %c0_29, %c0_30], %47 {strides = array<i32>} : memref<1x4x8x16xf32, #tpu.memory_space<vmem>>, vector<1x1x8x16xf32>,
    %48 = vector.extract_strided_slice %35 {offsets = [0, 16], sizes = [8, 16], strides = [1, 1]} : vector<8x64xf32> to vector<8x16xf32>
    %c0_31 = arith.constant 0 : index
    %c1_32 = arith.constant 1 : index
    %c0_33 = arith.constant 0 : index
    %c0_34 = arith.constant 0 : index
    %49 = vector.load %arg10[%c0_31, %c1_32, %c0_33, %c0_34] : memref<1x4x8x16xf32, #tpu.memory_space<vmem>>, vector<1x1x8x16xf32>
    %50 = vector.shape_cast %49 : vector<1x1x8x16xf32> to vector<8x16xf32>
    %51 = vector.shape_cast %48 : vector<8x16xf32> to vector<1x1x8x16xf32>
    tpu.vector_store %arg10[%c0_31, %c1_32, %c0_33, %c0_34], %51 {strides = array<i32>} : memref<1x4x8x16xf32, #tpu.memory_space<vmem>>, vector<1x1x8x16xf32>,
    %52 = vector.extract_strided_slice %30 {offsets = [0, 32], sizes = [8, 16], strides = [1, 1]} : vector<8x64xf32> to vector<8x16xf32>
    %c0_35 = arith.constant 0 : index
    %c2 = arith.constant 2 : index
    %c0_36 = arith.constant 0 : index
    %c0_37 = arith.constant 0 : index
    %53 = vector.load %arg9[%c0_35, %c2, %c0_36, %c0_37] : memref<1x4x8x16xf32, #tpu.memory_space<vmem>>, vector<1x1x8x16xf32>
    %54 = vector.shape_cast %53 : vector<1x1x8x16xf32> to vector<8x16xf32>
    %55 = vector.shape_cast %52 : vector<8x16xf32> to vector<1x1x8x16xf32>
    tpu.vector_store %arg9[%c0_35, %c2, %c0_36, %c0_37], %55 {strides = array<i32>} : memref<1x4x8x16xf32, #tpu.memory_space<vmem>>, vector<1x1x8x16xf32>,
    %56 = vector.extract_strided_slice %35 {offsets = [0, 32], sizes = [8, 16], strides = [1, 1]} : vector<8x64xf32> to vector<8x16xf32>
    %c0_38 = arith.constant 0 : index
    %c2_39 = arith.constant 2 : index
    %c0_40 = arith.constant 0 : index
    %c0_41 = arith.constant 0 : index
    %57 = vector.load %arg10[%c0_38, %c2_39, %c0_40, %c0_41] : memref<1x4x8x16xf32, #tpu.memory_space<vmem>>, vector<1x1x8x16xf32>
    %58 = vector.shape_cast %57 : vector<1x1x8x16xf32> to vector<8x16xf32>
    %59 = vector.shape_cast %56 : vector<8x16xf32> to vector<1x1x8x16xf32>
    tpu.vector_store %arg10[%c0_38, %c2_39, %c0_40, %c0_41], %59 {strides = array<i32>} : memref<1x4x8x16xf32, #tpu.memory_space<vmem>>, vector<1x1x8x16xf32>,
    %60 = vector.extract_strided_slice %30 {offsets = [0, 48], sizes = [8, 16], strides = [1, 1]} : vector<8x64xf32> to vector<8x16xf32>
    %c0_42 = arith.constant 0 : index
    %c3 = arith.constant 3 : index
    %c0_43 = arith.constant 0 : index
    %c0_44 = arith.constant 0 : index
    %61 = vector.load %arg9[%c0_42, %c3, %c0_43, %c0_44] : memref<1x4x8x16xf32, #tpu.memory_space<vmem>>, vector<1x1x8x16xf32>
    %62 = vector.shape_cast %61 : vector<1x1x8x16xf32> to vector<8x16xf32>
    %63 = vector.shape_cast %60 : vector<8x16xf32> to vector<1x1x8x16xf32>
    tpu.vector_store %arg9[%c0_42, %c3, %c0_43, %c0_44], %63 {strides = array<i32>} : memref<1x4x8x16xf32, #tpu.memory_space<vmem>>, vector<1x1x8x16xf32>,
    %64 = vector.extract_strided_slice %35 {offsets = [0, 48], sizes = [8, 16], strides = [1, 1]} : vector<8x64xf32> to vector<8x16xf32>
    %c0_45 = arith.constant 0 : index
    %c3_46 = arith.constant 3 : index
    %c0_47 = arith.constant 0 : index
    %c0_48 = arith.constant 0 : index
    %65 = vector.load %arg10[%c0_45, %c3_46, %c0_47, %c0_48] : memref<1x4x8x16xf32, #tpu.memory_space<vmem>>, vector<1x1x8x16xf32>
    %66 = vector.shape_cast %65 : vector<1x1x8x16xf32> to vector<8x16xf32>
    %67 = vector.shape_cast %64 : vector<8x16xf32> to vector<1x1x8x16xf32>
    tpu.vector_store %arg10[%c0_45, %c3_46, %c0_47, %c0_48], %67 {strides = array<i32>} : memref<1x4x8x16xf32, #tpu.memory_space<vmem>>, vector<1x1x8x16xf32>,
    return
  }
  func.func @transform_0(%arg0: i32, %arg1: i32) -> (i32, i32, i32) {
    %c0_i32 = arith.constant 0 : i32
    %c0_i32_0 = arith.constant 0 : i32
    return %arg0, %arg1, %c0_i32 : i32, i32, i32
  }
  func.func @transform_1(%arg0: i32, %arg1: i32) -> (i32, i32) {
    %c0_i32 = arith.constant 0 : i32
    %c0_i32_0 = arith.constant 0 : i32
    %c0_i32_1 = arith.constant 0 : i32
    return %c0_i32, %c0_i32_0 : i32, i32
  }
  func.func @transform_2(%arg0: i32, %arg1: i32) -> (i32, i32) {
    %c0_i32 = arith.constant 0 : i32
    %c0_i32_0 = arith.constant 0 : i32
    %c0_i32_1 = arith.constant 0 : i32
    return %c0_i32, %c0_i32_0 : i32, i32
  }
  func.func @transform_3(%arg0: i32, %arg1: i32) -> (i32, i32) {
    %c0_i32 = arith.constant 0 : i32
    %c0_i32_0 = arith.constant 0 : i32
    %c0_i32_1 = arith.constant 0 : i32
    return %c0_i32, %c0_i32_0 : i32, i32
  }
  func.func @transform_4(%arg0: i32, %arg1: i32) -> (i32, i32) {
    %c0_i32 = arith.constant 0 : i32
    %c0_i32_0 = arith.constant 0 : i32
    %c0_i32_1 = arith.constant 0 : i32
    return %c0_i32, %c0_i32_0 : i32, i32
  }
  func.func @transform_5(%arg0: i32, %arg1: i32) -> (i32, i32) {
    %c0_i32 = arith.constant 0 : i32
    %c0_i32_0 = arith.constant 0 : i32
    %c0_i32_1 = arith.constant 0 : i32
    return %c0_i32, %c0_i32_0 : i32, i32
  }
  func.func @transform_6(%arg0: i32, %arg1: i32) -> (i32, i32) {
    %c0_i32 = arith.constant 0 : i32
    %c0_i32_0 = arith.constant 0 : i32
    %c0_i32_1 = arith.constant 0 : i32
    return %c0_i32, %c0_i32_0 : i32, i32
  }
  func.func @transform_7(%arg0: i32, %arg1: i32) -> (i32, i32, i32, i32) {
    %c0_i32 = arith.constant 0 : i32
    %c0_i32_0 = arith.constant 0 : i32
    %c0_i32_1 = arith.constant 0 : i32
    return %arg0, %c0_i32, %arg1, %c0_i32_0 : i32, i32, i32, i32
  }
  func.func @transform_8(%arg0: i32, %arg1: i32) -> (i32, i32, i32, i32) {
    %c0_i32 = arith.constant 0 : i32
    %c0_i32_0 = arith.constant 0 : i32
    %c0_i32_1 = arith.constant 0 : i32
    return %arg0, %c0_i32, %arg1, %c0_i32_0 : i32, i32, i32, i32
  }
}

</mosaic_0001>

<bundles_post_ra>
// kernel: tpu_custom_call.1
= control target key start
LH: loop header
LB: loop body
LE: loop exit
PB: predicated region body
PF: predicated region fallthrough
CT: control target
= control target key end

     0   :  { %s1883_s0 = inlined_call_operand.hbm [shape: f32[2,8,32], index: 0, kind: input, shape index: {}]   ;;  %s1884_s1 = inlined_call_operand.hbm [shape: f32[1,32], index: 1, kind: input, shape index: {}]   ;;  %s1885_s2 = inlined_call_operand.hbm [shape: f32[1,32], index: 2, kind: input, shape index: {}]   ;;  %s1886_s3 = inlined_call_operand.hbm [shape: f32[32,64], index: 3, kind: input, shape index: {}]   ;;  %s1887_s4 = inlined_call_operand.hbm [shape: f32[1,64], index: 4, kind: input, shape index: {}]   ;;  %s1888_s5 = inlined_call_operand.hbm [shape: f32[32,64], index: 5, kind: input, shape index: {}]   ;;  %s1889_s6 = inlined_call_operand.hbm [shape: f32[1,64], index: 6, kind: input, shape index: {}]   ;;  %s1890_s7 = inlined_call_operand.hbm [shape: f32[2,4,8,16], index: 7, kind: output, shape index: {0}]   ;;  %s1891_s8 = inlined_call_operand.hbm [shape: f32[2,4,8,16], index: 8, kind: output, shape index: {1}]  }
   0x1   :  { %1898 = sst [smem:[#allocation23_spill]] %s1883_s0 }
   0x2   :  { %1899 = sst [smem:[#allocation24_spill]] %s1884_s1 }
   0x3   :  { %1900 = sst [smem:[#allocation25_spill]] %s1885_s2 }
   0x4   :  { %1901 = sst [smem:[#allocation26_spill]] %s1886_s3 }
   0x5   :  { %1902 = sst [smem:[#allocation27_spill]] %s1887_s4 }
   0x6   :  { %1903 = sst [smem:[#allocation28_spill]] %s1891_s8 }
   0x7   :  { %14 = vsyncpa [#allocation3], 0 }
   0x8   :  { %16 = vsyncpa [#allocation3 + $0x1], 0 }
   0x9   :  { %17 = vsyncpa [#allocation6], 0 }
   0xa   :  { %18 = vsyncpa [#allocation9], 0 }
   0xb   :  { %19 = vsyncpa [#allocation12], 0 }
   0xc   :  { %20 = vsyncpa [#allocation4], 0 }
   0xd   :  { %22 = vsyncpa [#allocation4 + $0x1], 0 }
   0xe   :  { %23 = vsyncpa [#allocation16], 0 }
   0xf   :  { %25 = vsyncpa [#allocation16 + $0x1], 0  ;;  %s1492_s27 = smov 0   ;;  %s1494_s28 = smov 0  }
  0x10   :  { %s1496_s29 = smov 0   ;;  %s1498_s30 = smov 0  }
  0x11   :  { %s1500_s9 = smov 0   ;;  %s1502_s10 = smov 0  }
  0x12 LB: > { %s1895_s11 = sadd.s32 4294967295, %s1426_s10   ;;  %p876_p0 = scmp.ge.s32.totalorder %s1426_s10, 1  ;;  %s1426_s10 = sphi %s1502_s10, %s31_s10   ;;  %s1422_s9 = sphi %s1500_s9, %s1930_s9   ;;  %s1418_s30 = sphi %s1498_s30, %s1929_s30   ;;  %s1414_s29 = sphi %s1496_s29, %s1928_s29   ;;  %s1410_s28 = sphi %s1494_s28, %s1927_s28   ;;  %s1406_s27 = sphi %s1492_s27, %s1926_s27  }
  0x13   : > { %p1526_p1 = scmp.eq.s32.totalorder %s1895_s11, 0  ;;  %p258_p2 = scmp.lt.s32.totalorder %s1426_s10, 3 }
  0x14   : > { %s1428_s14 = smov [#allocation5]   ;;  %s1429_s16 = smov [#allocation8]  }
  0x15   : > { %s1904_s12 = scalar_select %p1526_p1, 1, 0 }
  0x16   : > { %p1531_p3 = pnand %p876_p0, %p258_p2  ;;  %s271_s15 = sshll.u32 %s1428_s14, 4  ;;  %s272_s15 = int_to_ptr.vmem [resolvable:$true] %s271_s15 }
  0x17   : > { %s292_s17 = sshll.u32 %s1429_s16, 4  ;;  %s1430_s19 = smov [#allocation11]   ;;  %s1544_s17 = int_to_ptr.vmem [resolvable:$true] %s292_s17 }
  0x18   : > { %s1905_s13 = scalar_select %p1531_p3, 1, 0 }
  0x19   : > { %p992_p5 = pneg %p1531_p3  ;;  %s1546_s20 = sshll.u32 %s1430_s19, 4  ;;  %s317_s20 = int_to_ptr.vmem [resolvable:$true] %s1546_s20 }
  0x1a   : > { %s1907_s1 = sld [smem:[#allocation24_spill]] }
  0x1b   : > { %p1540_p6 = pnand %p992_p5, %p1526_p1 }
  0x1d   : > { %p1556_p8 = pneg %p1540_p6 }
  0x20   : > { %s1102_s23 = scalar_lea.hbm %s1907_s1, 16 }
  0x21   : > { %p1103_p7 = scmp.ne.s32.totalorder %s1907_s1, %s1102_s23  ;;  %p1109_p11 = scmp.lt.u32.totalorder %s1102_s23, %s1907_s1 }
  0x23   : > { %p1105_p9 = pnand %p1556_p8, %p1103_p7 }
  0x25   : > { %p1106_p10 = pneg %p1105_p9 }
  0x27   : > { %p1111_p12 = pnand %p1109_p11, %p1106_p10 }
  0x29   : > { %1114 = shalt.err (!%p1111_p12)
}
  0x2a   : > { %s1115_s19 = scalar_lea.vmem %s272_s15, 16  ;;  %s1122_s21 = scalar_lea.vmem %s272_s15, 32 }
  0x2b   : > { %p1116_p13 = scmp.ne.s32.totalorder %s272_s15, %s1115_s19  ;;  %p1123_p5 = scmp.lt.s32.totalorder %s272_s15, %s272_s15 }
  0x2c   : > { %p1124_p4 = scmp.lt.s32.totalorder %s1122_s21, %s1115_s19 }
  0x2d   : > { %p1118_p0 = pnand %p1116_p13, %p1556_p8 }
  0x2e   : > { %p1125_p3 = por %p1124_p4, %p1123_p5 }
  0x2f   : > { %p1119_p2 = pneg %p1118_p0 }
  0x31   : > { %p1126_p1 = pnand %p1125_p3, %p1119_p2 }
  0x33   : > { %1129 = shalt.err (!%p1126_p1)
}
  0x34   : > { %995 = dma.hbm_to_vmem [thread:$0]  (!%p1540_p6), %s1907_s1, 16, %s272_s15, [#allocation6]  }
  0x35   : > { %s1909_s3 = sld [smem:[#allocation26_spill]] }
  0x3b   : > { %s1130_s14 = scalar_lea.hbm %s1909_s3, 512 }
  0x3c   : > { %p1131_p7 = scmp.ne.s32.totalorder %s1909_s3, %s1130_s14  ;;  %p1137_p1 = scmp.lt.u32.totalorder %s1130_s14, %s1909_s3 }
  0x3e   : > { %p1133_p9 = pnand %p1131_p7, %p1556_p8 }
  0x40   : > { %p1134_p4 = pneg %p1133_p9 }
  0x42   : > { %p1139_p3 = pnand %p1137_p1, %p1134_p4 }
  0x44   : > { %1142 = shalt.err (!%p1139_p3)
}
  0x45   : > { %s1143_s15 = scalar_lea.vmem %s1544_s17, 512  ;;  %p1151_p13 = scmp.lt.s32.totalorder %s1544_s17, %s1544_s17 }
  0x46   : > { %p1144_p10 = scmp.ne.s32.totalorder %s1544_s17, %s1143_s15  ;;  %p1152_p0 = scmp.lt.s32.totalorder %s1143_s15, %s1143_s15 }
  0x48   : > { %p1146_p11 = pnand %p1144_p10, %p1556_p8  ;;  %p1153_p2 = por %p1152_p0, %p1151_p13 }
  0x4a   : > { %p1147_p12 = pneg %p1146_p11 }
  0x4c   : > { %p1154_p5 = pnand %p1153_p2, %p1147_p12 }
  0x4e   : > { %1157 = shalt.err (!%p1154_p5)
}
  0x4f   : > { %s1431_s11 = smov 128   ;;  %s1432_s22 = smov 8  }
  0x50   : > { %1001 = dma.hbm_to_vmem [thread:$0]  (!%p1540_p6), %s1909_s3, 512, %s1544_s17, [#allocation9], %s1431_s11, %s1431_s11, %s1432_s22  }
  0x51   : > { %s1158_s16 = scalar_lea.hbm %s1888_s5, 512 }
  0x52   : > { %p1159_p7 = scmp.ne.s32.totalorder %s1888_s5, %s1158_s16  ;;  %p1165_p1 = scmp.lt.u32.totalorder %s1158_s16, %s1888_s5 }
  0x54   : > { %p1161_p9 = pnand %p1159_p7, %p1556_p8 }
  0x56   : > { %p1162_p4 = pneg %p1161_p9 }
  0x58   : > { %p1167_p3 = pnand %p1165_p1, %p1162_p4 }
  0x5a   : > { %1170 = shalt.err (!%p1167_p3)
}
  0x5b   : > { %s1171_s24 = scalar_lea.vmem %s317_s20, 512  ;;  %p1179_p13 = scmp.lt.s32.totalorder %s317_s20, %s317_s20 }
  0x5c   : > { %p1172_p10 = scmp.ne.s32.totalorder %s317_s20, %s1171_s24  ;;  %p1180_p0 = scmp.lt.s32.totalorder %s1171_s24, %s1171_s24 }
  0x5e   : > { %p1174_p11 = pnand %p1172_p10, %p1556_p8  ;;  %p1181_p2 = por %p1180_p0, %p1179_p13 }
  0x60   : > { %p1175_p12 = pneg %p1174_p11 }
  0x62   : > { %p1182_p5 = pnand %p1181_p2, %p1175_p12 }
  0x64   : > { %1185 = shalt.err (!%p1182_p5)
}
  0x65   : > { %1007 = dma.hbm_to_vmem [thread:$0]  (!%p1540_p6), %s1888_s5, 512, %s317_s20, [#allocation12], %s1431_s11, %s1431_s11, %s1432_s22  }
  0x66   : > { %s1433_s1 = smov [#allocation7]   ;;  %s1434_s14 = smov [#allocation10]  }
  0x67   : > { %s282_s25 = sshll.u32 %s1433_s1, 4  ;;  %s306_s16 = sshll.u32 %s1434_s14, 4  ;;  %s283_s25 = int_to_ptr.vmem [resolvable:$true] %s282_s25  ;;  %s307_s16 = int_to_ptr.vmem [resolvable:$true] %s306_s16 }
  0x68   : > { %s1910_s2 = sld [smem:[#allocation25_spill]] }
  0x6e   : > { %s1186_s15 = scalar_lea.hbm %s1910_s2, 16 }
  0x6f   : > { %p1187_p7 = scmp.ne.s32.totalorder %s1910_s2, %s1186_s15  ;;  %p1193_p1 = scmp.lt.u32.totalorder %s1186_s15, %s1910_s2 }
  0x71   : > { %p1189_p9 = pnand %p1187_p7, %p1556_p8 }
  0x73   : > { %p1190_p4 = pneg %p1189_p9 }
  0x75   : > { %p1195_p3 = pnand %p1193_p1, %p1190_p4 }
  0x77   : > { %1198 = shalt.err (!%p1195_p3)
}
  0x78   : > { %s1199_s20 = scalar_lea.vmem %s283_s25, 16  ;;  %s1206_s11 = scalar_lea.vmem %s283_s25, 32 }
  0x79   : > { %p1200_p10 = scmp.ne.s32.totalorder %s283_s25, %s1199_s20  ;;  %p1207_p13 = scmp.lt.s32.totalorder %s283_s25, %s283_s25 }
  0x7a   : > { %p1208_p0 = scmp.lt.s32.totalorder %s1206_s11, %s1199_s20 }
  0x7b   : > { %p1202_p11 = pnand %p1200_p10, %p1556_p8 }
  0x7c   : > { %p1209_p2 = por %p1208_p0, %p1207_p13 }
  0x7d   : > { %p1203_p12 = pneg %p1202_p11 }
  0x7f   : > { %p1210_p5 = pnand %p1209_p2, %p1203_p12 }
  0x81   : > { %1213 = shalt.err (!%p1210_p5)
}
  0x82   : > { %998 = dma.hbm_to_vmem [thread:$0]  (!%p1540_p6), %s1910_s2, 16, %s283_s25, [#allocation6]  }
  0x83   : > { %s1911_s4 = sld [smem:[#allocation27_spill]] }
  0x89   : > { %s1214_s1 = scalar_lea.hbm %s1911_s4, 16 }
  0x8a   : > { %p1215_p7 = scmp.ne.s32.totalorder %s1911_s4, %s1214_s1  ;;  %p1221_p1 = scmp.lt.u32.totalorder %s1214_s1, %s1911_s4 }
  0x8c   : > { %p1217_p9 = pnand %p1215_p7, %p1556_p8 }
  0x8e   : > { %p1218_p4 = pneg %p1217_p9 }
  0x90   : > { %p1223_p3 = pnand %p1221_p1, %p1218_p4 }
  0x92   : > { %1226 = shalt.err (!%p1223_p3)
}
  0x93   : > { %s1227_s24 = scalar_lea.vmem %s307_s16, 16  ;;  %s1234_s25 = scalar_lea.vmem %s307_s16, 32 }
  0x94   : > { %p1228_p10 = scmp.ne.s32.totalorder %s307_s16, %s1227_s24  ;;  %p1235_p13 = scmp.lt.s32.totalorder %s307_s16, %s307_s16 }
  0x95   : > { %p1236_p0 = scmp.lt.s32.totalorder %s1234_s25, %s1227_s24 }
  0x96   : > { %p1230_p11 = pnand %p1228_p10, %p1556_p8 }
  0x97   : > { %p1237_p2 = por %p1236_p0, %p1235_p13 }
  0x98   : > { %p1231_p12 = pneg %p1230_p11 }
  0x9a   : > { %p1238_p5 = pnand %p1237_p2, %p1231_p12 }
  0x9c   : > { %1241 = shalt.err (!%p1238_p5)
}
  0x9d   : > { %1004 = dma.hbm_to_vmem [thread:$0]  (!%p1540_p6), %s1911_s4, 16, %s307_s16, [#allocation9]  }
  0x9e   : > { %s1435_s11 = smov [#allocation13]   ;;  %s1242_s23 = scalar_lea.hbm %s1889_s6, 16 }
  0x9f   : > { %s330_s3 = sshll.u32 %s1435_s11, 4  ;;  %p1243_p7 = scmp.ne.s32.totalorder %s1889_s6, %s1242_s23  ;;  %s331_s3 = int_to_ptr.vmem [resolvable:$true] %s330_s3 }
  0xa0   : > { %p1249_p1 = scmp.lt.u32.totalorder %s1242_s23, %s1889_s6 }
  0xa1   : > { %p1245_p9 = pnand %p1243_p7, %p1556_p8 }
  0xa3   : > { %p1246_p4 = pneg %p1245_p9 }
  0xa5   : > { %p1251_p3 = pnand %p1249_p1, %p1246_p4 }
  0xa7   : > { %1254 = shalt.err (!%p1251_p3)
}
  0xa8   : > { %s1255_s16 = scalar_lea.vmem %s331_s3, 16  ;;  %s1262_s15 = scalar_lea.vmem %s331_s3, 32 }
  0xa9   : > { %p1256_p10 = scmp.ne.s32.totalorder %s331_s3, %s1255_s16  ;;  %p1263_p13 = scmp.lt.s32.totalorder %s331_s3, %s331_s3 }
  0xaa   : > { %p1264_p0 = scmp.lt.s32.totalorder %s1262_s15, %s1255_s16 }
  0xab   : > { %p1258_p11 = pnand %p1256_p10, %p1556_p8 }
  0xac   : > { %p1265_p2 = por %p1264_p0, %p1263_p13 }
  0xad   : > { %p1259_p12 = pneg %p1258_p11 }
  0xaf   : > { %p1266_p5 = pnand %p1265_p2, %p1259_p12 }
  0xb1   : > { %1269 = shalt.err (!%p1266_p5)
}
  0xb2   : > { %1010 = dma.hbm_to_vmem [thread:$0]  (!%p1540_p6), %s1889_s6, 16, %s331_s3, [#allocation12]  }
  0xb3   : > { %s875_s26 = sadd.s32 4294967294, %s1426_s10   ;;  %s43_s17 = sadd.s32 1, %s1422_s9 }
  0xb4   : > { %p45_p8 = scmp.ge.s32.totalorder %s43_s17, 2  ;;  %s52_s18 = sadd.s32 1, %s1414_s29 }
  0xb5   : > { %p59_p7 = scmp.ne.s32.totalorder %s1414_s29, %s1410_s28  ;;  %p60_p9 = scmp.eq.s32.totalorder %s1426_s10, 0 }
  0xb6   : > { %s1932_s17 = smov (%p45_p8, %s43_s17), 0  ;;  %p65_p1 = scmp.ne.s32.totalorder %s1410_s28, %s1406_s27 }
  0xb7   : > { %p1676_p4 = por %p60_p9, %p59_p7  ;;  %s47_s11 = ssub.s32 %s1422_s9, %s1932_s17 }
  0xb8   : > { %s1913_s3 = sadd.s32 4294967295, %s1426_s10   ;;  %p50_p3 = scmp.eq.s32.totalorder %s47_s11, 0 }
  0xb9   : > { %p217_p6 = scmp.eq.s32.totalorder %s1913_s3, 1  ;;  %p1914_p10 = scmp.ne.s32.totalorder %s1904_s12, 0 }
  0xba   : > { %p223_p13 = scmp.eq.s32.totalorder %s875_s26, 1  ;;  %p1028_p2 = scmp.lt.s32.totalorder %s1426_s10, 2 }
  0xbb   : > { %p1688_p11 = por %p1914_p10, %p65_p1  ;;  %p1692_p12 = por %p217_p6, %p59_p7 }
  0xbc   : > { %s1697_s23 = scalar_select %p50_p3, %s1414_s29, %s52_s18  }
  0xbd   : > { %s1916_s8 = scalar_select %p1692_p12, 1, 0 }
  0xbe   : > { %p1699_p0 = por %p223_p13, %p65_p1  ;;  %s341_s14 = sand.u32 1, %s1414_s29  }
  0xbf   : > { %s885_s19 = sshll.u32 %s1422_s9, 7  ;;  %s884_s21 = sshll.u32 %s341_s14, 3 }
  0xc0   : > { %s1917_s1 = scalar_select %p1699_p0, 1, 0 }
  0xc1   : > { %s1918_s0 = sld [smem:[#allocation23_spill]]  ;;  %s345_s25 = scalar_lea.vmem [#allocation2], %s884_s21 }
  0xc2   : > { %s353_s26 = sshll.u32 %s345_s25, 4  ;;  %p1713_p5 = pnand %p1028_p2, %p1676_p4  ;;  %s1717_s26 = int_to_ptr.vmem [resolvable:$true] %s353_s26 }
  0xc3   : > { %s342_s11 = scalar_lea.sflag [#allocation3], %s341_s14 }
  0xc4   : > { %p1272_p7 = pneg %p1713_p5 }
  0xc7   : > { %s1709_s24 = scalar_lea.hbm %s1918_s0, %s885_s19  ;;  %s1275_s20 = scalar_lea.hbm %s1918_s0, 256 }
  0xc8   : > { %s1270_s3 = scalar_lea.hbm %s1709_s24, 128  ;;  %p1276_p4 = scmp.lt.u32.totalorder %s1709_s24, %s1918_s0 }
  0xc9   : > { %p1271_p8 = scmp.ne.s32.totalorder %s1709_s24, %s1270_s3  ;;  %p1277_p6 = scmp.lt.u32.totalorder %s1275_s20, %s1270_s3 }
  0xca   : > { %p1279_p10 = scmp.lt.u32.totalorder %s1270_s3, %s1709_s24 }
  0xcb   : > { %p1273_p9 = pnand %p1272_p7, %p1271_p8  ;;  %p1278_p3 = por %p1277_p6, %p1276_p4 }
  0xcd   : > { %p1274_p1 = pneg %p1273_p9  ;;  %p1280_p13 = por %p1279_p10, %p1278_p3 }
  0xcf   : > { %p1281_p2 = pnand %p1280_p13, %p1274_p1 }
  0xd1   : > { %1284 = shalt.err (!%p1281_p2)
}
  0xd2   : > { %s1285_s14 = scalar_lea.vmem %s1717_s26, 128  ;;  %s1436_s25 = smov [#allocation2]  }
  0xd3   : > { %p1286_p8 = scmp.ne.s32.totalorder %s1717_s26, %s1285_s14  ;;  %s1290_s19 = sshll.u32 %s1436_s25, 4  ;;  %s1291_s19 = int_to_ptr.vmem [resolvable:$false] %s1290_s19 }
  0xd4   : > { %s1292_s21 = scalar_lea.vmem %s1291_s19, 256  ;;  %p1293_p12 = scmp.lt.s32.totalorder %s1717_s26, %s1291_s19 }
  0xd5   : > { %p1288_p9 = pnand %p1286_p8, %p1272_p7  ;;  %p1294_p4 = scmp.lt.s32.totalorder %s1292_s21, %s1285_s14 }
  0xd7   : > { %p1289_p0 = pneg %p1288_p9  ;;  %p1295_p6 = por %p1294_p4, %p1293_p12 }
  0xd9   : > { %p1296_p3 = pnand %p1295_p6, %p1289_p0 }
  0xdb   : > { %1299 = shalt.err (!%p1296_p3)
}
  0xdc   : > { %1014 = dma.hbm_to_vmem [thread:$0]  (!%p1713_p5), %s1709_s24, 128, %s1717_s26, %s342_s11  }
  0xdd   : > { %p1920_p1 = scmp.ne.s32.totalorder %s1905_s13, 0 }
  0xde   : > { %s1747_s3 = sand.u32 (!%p1920_p1), 1, %s1410_s28  }
  0xdf   : > { %362 = sbr.rel (%p1920_p1) target bundleno = 932 (0x3a4), region = 48  ;;  %s887_s20 = sshll.u32 (!%p1920_p1), %s1747_s3, 3 }
  0xe0   : > { %s365_s16 = scalar_lea.sflag (!%p1920_p1), [#allocation3], %s1747_s3  ;;  %s368_s15 = scalar_lea.vmem (!%p1920_p1), [#allocation2], %s887_s20 }
  0xe6   : > { %1381 = dma.done.wait (%p1688_p11), %s365_s16, 128  }
  0xe7   : > { %1383 = vsyncadd (%p1688_p11), %s365_s16, 4294967168  ;;  %p1921_p12 = scmp.ne.s32.totalorder %s1904_s12, 0 }
  0xe9   : > { %1385 = dma.done.wait (%p1921_p12), [#allocation6], 32  }
  0xea   : > { %1387 = vsyncadd (%p1921_p12), [#allocation6], 4294967264 }
  0xeb   : > { %1389 = dma.done.wait (%p1921_p12), [#allocation9], 528  }
  0xec   : > { %1391 = vsyncadd (%p1921_p12), [#allocation9], 4294966768 }
  0xed   : > { %1393 = dma.done.wait (%p1921_p12), [#allocation12], 528  }
  0xee   : > { %1395 = vsyncadd (%p1921_p12), [#allocation12], 4294966768  ;;  %vm433_vm0 = vcmask 261120   ;;  %v430_v0 = vld [vmem:[%s368_s15] sm:$0xff]  ;;  %v462_v7 = vld [vmem:[#allocation8] sm:$0xff]  ;;  %v1437_v10 = vmov 0.0|0.0  }
  0xef   : > { %v434_v1 = vsel %vm433_vm0, %v430_v0, 0.0  ;;  %v463_v8 = vld [vmem:[#allocation8 + $0x8] sm:$0xff]  ;;  %950 = vmatprep.subr.bf16.mxu0 %v1437_v10  ;;  %956 = vmatprep.subr.bf16.mxu1 %v1437_v10  ;;  %v464_v13 = vld [vmem:[#allocation8 + $0x10] sm:$0xff]  ;;  %v465_v14 = vld [vmem:[#allocation8 + $0x18] sm:$0xff]  ;;  %vm1438_vm1 = vmmov 0   ;;  %v1439_v18 = vmov 0.0  }
  0xf0   : > { %435 = vadd.xlane.f32.xlu0 %v434_v1  ;;  %v546_v9 = vld [vmem:[#allocation11] sm:$0xff]  ;;  %v951_v11 = vpack.c.bf16 %v463_v8, %v462_v7  ;;  %v547_v12 = vld [vmem:[#allocation11 + $0x8] sm:$0xff]  ;;  %v548_v16 = vld [vmem:[#allocation11 + $0x10] sm:$0xff]  ;;  %936 = vmatprep.mubr.msk.f32.mxu0 %vm1438_vm1, %v1439_v18  ;;  %v954_v19 = vpack.c.bf16 %v465_v14, %v464_v13  ;;  %s894_s12 = sshll.u32 %s1747_s3, 5  ;;  %vm627_vm2 = vcmask 130048   ;;  %s1440_s24 = smov 96  }
  0xf1   : > { %v957_v15 = vpack.c.bf16 %v547_v12, %v546_v9  ;;  %v549_v17 = vld [vmem:[#allocation11 + $0x18] sm:$0xff]  ;;  %947 = vmatprep.mubr.msk.f32.mxu1 %vm1438_vm1, %v1439_v18  ;;  %v900_v31 = vld [vmem:[#allocation13] ss:$0 sm:$0xff]  ;;  %s422_s13 = scalar_lea.vmem [#allocation14], %s894_s12  ;;  %s1773_s22 = scalar_lea.vmem [#allocation15], %s894_s12 }
  0xf2   : > { %952 = vmatpush3.bf16.msra.mxu0 %v951_v11  ;;  %v960_v20 = vpack.c.bf16 %v549_v17, %v548_v16  ;;  %v896_v25 = vld [vmem:[#allocation5] ss:$0 sm:$0xff]  ;;  %v897_v27 = vld [vmem:[#allocation7] ss:$0 sm:$0xff]  ;;  %v898_v30 = vld [vmem:[#allocation10] ss:$0 sm:$0xff] }
  0xf3   : > { %958 = vmatpush3.bf16.msra.mxu1 %v957_v15  ;;  %953 = vmatprep.subr.bf16.mxu0 %v1437_v10  ;;  %s1441_s26 = smov 112   ;;  %s1442_s18 = smov 80  }
  0xf4   : > { %959 = vmatprep.subr.bf16.mxu1 %v1437_v10  ;;  %s682_s11 = sshll.u32 %s422_s13, 4  ;;  %s916_s14 = sshll.u32 %s1418_s30, 9  ;;  %s1782_s11 = int_to_ptr.vmem [resolvable:$true] %s682_s11 }
  0xf5   : > { %s699_s25 = sshll.u32 %s1773_s22, 4  ;;  %s1792_s20 = scalar_lea.hbm %s1890_s7, %s916_s14  ;;  %s1794_s25 = int_to_ptr.vmem [resolvable:$true] %s699_s25 }
  0xf6   : > { %955 = vmatpush3.bf16.msra.mxu0 %v954_v19  ;;  %s663_s16 = scalar_lea.sflag [#allocation4], %s1747_s3  ;;  %s1300_s15 = scalar_lea.vmem %s1782_s11, 512 }
  0xf7   : > { %961 = vmatpush3.bf16.msra.mxu1 %v960_v20  ;;  %p1301_p11 = scmp.ne.s32.totalorder %s1782_s11, %s1300_s15  ;;  %p1922_p0 = scmp.ne.s32.totalorder %s1916_s8, 0 }
  0xf8   : > { %s1443_s12 = smov [#allocation14]  }
  0xf9   : > { %p1302_p5 = pnand %p1301_p11, %p1922_p0 }
  0xfb   : > { %p1303_p7 = pneg %p1302_p5 }
 0x17d   : > { %v436_v2 = vpop.xlane.xlu0 %435 }
 0x17e   : > { %v438_v3 = vmul.f32 0.03125, %v436_v2 }
 0x180   : > { %v439_v4 = vsub.f32 %v430_v0, %v438_v3 }
 0x182   : > { %v440_v5 = vmul.f32 %v439_v4, %v439_v4 }
 0x184   : > { %v441_v6 = vsel %vm433_vm0, %v440_v5, 0.0 }
 0x185   : > { %442 = vadd.xlane.f32.xlu0 %v441_v6 }
 0x212   : > { %v443_v21 = vpop.xlane.xlu0 %442 }
 0x213   : > { %v444_v22 = vmul.f32 0.03125, %v443_v21 }
 0x215   : > { %v445_v23 = vadd.f32 1e-05, %v444_v22 }
 0x217   : > { %1100 = vrsqrt.f32 %v445_v23 }
 0x221   : > { %v1101_v24 = vpop.eup %1100 }
 0x222   : > { %v447_v26 = vmul.f32 %v1101_v24, %v439_v4 }
 0x224   : > { %v454_v28 = vmul.f32 %v896_v25, %v447_v26 }
 0x226   : > { %v461_v29 = vadd.f32 %v897_v27, %v454_v28 }
 0x228   : > { %937 = vmatmul.mubr.msk.f32.vlgmr.msra.gmra.mrb[0].mxu0 %vm433_vm0, %v461_v29  ;;  %948 = vmatmul.mubr.msk.f32.vlgmr.msra.gmra.mrb[0].mxu1 %vm433_vm0, %v461_v29 }
 0x2fb   : > { %v542_v32 = vpop.f32.mrb[0].mxu0  ;;  %v623_v33 = vpop.f32.mrb[0].mxu1 }
 0x2fc   : > { %v543_v34 = vadd.f32 %v898_v30, %v542_v32  ;;  %v624_v35 = vadd.f32 %v900_v31, %v623_v33  ;;  %v938_v36 = vpop.f32.mrb[1].mxu0  ;;  %v949_v37 = vpop.f32.mrb[1].mxu1 }
 0x2fe   : > { %628 = vst.msk [vmem:[%s422_s13] sm:$0xff] %vm627_vm2, %v543_v34  ;;  %629 = vst.msk [vmem:[%s1773_s22] sm:$0xff] %vm627_vm2, %v624_v35  ;;  %642 = vrot.lane.b32.xlu0 %v543_v34, %s1440_s24  ;;  %631 = vrot.lane.b32.xlu1 %v543_v34, %s1441_s26 }
 0x302   : > { %637 = vrot.lane.b32.xlu1 %v624_v35, %s1441_s26 }
 0x306   : > { %647 = vrot.lane.b32.xlu1 %v624_v35, %s1440_s24  ;;  %s1304_s24 = sshll.u32 %s1443_s12, 4  ;;  %s1305_s24 = int_to_ptr.vmem [resolvable:$false] %s1304_s24 }
 0x307   : > { %s1306_s26 = scalar_lea.vmem %s1305_s24, 1024  ;;  %p1307_p10 = scmp.lt.s32.totalorder %s1782_s11, %s1305_s24 }
 0x308   : > { %p1308_p13 = scmp.lt.s32.totalorder %s1306_s26, %s1300_s15 }
 0x30a   : > { %652 = vrot.lane.b32.xlu1 %v543_v34, %s1442_s18  ;;  %p1309_p2 = por %p1308_p13, %p1307_p10 }
 0x30c   : > { %p1310_p8 = pnand %p1309_p2, %p1303_p7 }
 0x30e   : > { %657 = vrot.lane.b32.xlu1 %v624_v35, %s1442_s18 }
 0x370   : > { %v643_v38 = vpop.permute.xlu0 %642  ;;  %v632_v39 = vpop.permute.xlu1 %631 }
 0x371   : > { %904 = vst.msk [vmem:[%s422_s13 + $0x10] sm:$0xff] %vm627_vm2, %v643_v38  ;;  %902 = vst.msk [vmem:[%s422_s13 + $0x8] sm:$0xff] %vm627_vm2, %v632_v39 }
 0x374   : > { %v638_v40 = vpop.permute.xlu1 %637 }
 0x375   : > { %903 = vst.msk [vmem:[%s1773_s22 + $0x8] sm:$0xff] %vm627_vm2, %v638_v40 }
 0x378   : > { %v648_v41 = vpop.permute.xlu1 %647 }
 0x379   : > { %905 = vst.msk [vmem:[%s1773_s22 + $0x10] sm:$0xff] %vm627_vm2, %v648_v41 }
 0x37c   : > { %v653_v42 = vpop.permute.xlu1 %652 }
 0x37d   : > { %906 = vst.msk [vmem:[%s422_s13 + $0x18] sm:$0xff] %vm627_vm2, %v653_v42 }
 0x37e   : > { %1313 = shalt.err (!%p1310_p8)
}
 0x37f   : > { %s1314_s13 = scalar_lea.hbm %s1792_s20, 512  ;;  %s1318_s21 = scalar_lea.hbm %s1890_s7, 1024 }
 0x380   : > { %p1315_p9 = scmp.ne.s32.totalorder %s1792_s20, %s1314_s13  ;;  %p1319_p3 = scmp.lt.u32.totalorder %s1792_s20, %s1890_s7 }
 0x381   : > { %p1320_p1 = scmp.lt.u32.totalorder %s1318_s21, %s1314_s13  ;;  %p1322_p11 = scmp.lt.u32.totalorder %s1314_s13, %s1792_s20 }
 0x382   : > { %p1316_p4 = pnand %p1315_p9, %p1922_p0 }
 0x383   : > { %p1321_p12 = por %p1320_p1, %p1319_p3 }
 0x384   : > { %p1317_p6 = pneg %p1316_p4 }
 0x385   : > { %p1323_p5 = por %p1322_p11, %p1321_p12 }
 0x387   : > { %p1324_p7 = pnand %p1323_p5, %p1317_p6 }
 0x389   : > { %1327 = shalt.err (!%p1324_p7)
}
 0x38a   : > { %s1444_s15 = smov 128   ;;  %s1445_s26 = smov 8   ;;  %v658_v43 = vpop.permute.xlu1 %657 }
 0x38b   : > { %988 = dma.vmem_to_hbm [thread:$0]  (%p1922_p0), %s1782_s11, 512, %s1792_s20, %s663_s16, %s1444_s15, %s1444_s15, %s1445_s26  }
 0x38c   : > { %s1923_s19 = sld [smem:[#allocation28_spill]]  ;;  %907 = vst.msk [vmem:[%s1773_s22 + $0x18] sm:$0xff] %vm627_vm2, %v658_v43  ;;  %s668_s12 = scalar_lea.sflag [#allocation16], %s1747_s3 }
 0x38d   : > { %s1328_s24 = scalar_lea.vmem %s1794_s25, 512  ;;  %s1446_s0 = smov [#allocation15]  }
 0x38e   : > { %p1329_p10 = scmp.ne.s32.totalorder %s1794_s25, %s1328_s24  ;;  %s1332_s2 = sshll.u32 %s1446_s0, 4  ;;  %s1333_s2 = int_to_ptr.vmem [resolvable:$false] %s1332_s2 }
 0x38f   : > { %s1334_s4 = scalar_lea.vmem %s1333_s2, 1024  ;;  %p1335_p8 = scmp.lt.s32.totalorder %s1794_s25, %s1333_s2 }
 0x390   : > { %p1330_p13 = pnand %p1329_p10, %p1922_p0  ;;  %p1336_p9 = scmp.lt.s32.totalorder %s1334_s4, %s1328_s24 }
 0x392   : > { %s1829_s21 = scalar_lea.hbm %s1923_s19, %s916_s14  ;;  %p1331_p2 = pneg %p1330_p13 }
 0x393   : > { %p1337_p4 = por %p1336_p9, %p1335_p8 }
 0x395   : > { %p1338_p6 = pnand %p1337_p4, %p1331_p2 }
 0x397   : > { %1341 = shalt.err (!%p1338_p6)
}
 0x398   : > { %s1342_s30 = scalar_lea.hbm %s1829_s21, 512  ;;  %s1346_s0 = scalar_lea.hbm %s1923_s19, 1024 }
 0x399   : > { %p1343_p3 = scmp.ne.s32.totalorder %s1829_s21, %s1342_s30  ;;  %p1347_p11 = scmp.lt.u32.totalorder %s1829_s21, %s1923_s19 }
 0x39a   : > { %p1348_p5 = scmp.lt.u32.totalorder %s1346_s0, %s1342_s30  ;;  %p1350_p10 = scmp.lt.u32.totalorder %s1342_s30, %s1829_s21 }
 0x39b   : > { %p1344_p1 = pnand %p1343_p3, %p1922_p0 }
 0x39c   : > { %p1349_p7 = por %p1348_p5, %p1347_p11 }
 0x39d   : > { %p1345_p12 = pneg %p1344_p1 }
 0x39e   : > { %p1351_p13 = por %p1350_p10, %p1349_p7 }
 0x3a0   : > { %p1352_p2 = pnand %p1351_p13, %p1345_p12 }
 0x3a2   : > { %1355 = shalt.err (!%p1352_p2)
}
 0x3a3   : > { %989 = dma.vmem_to_hbm [thread:$0]  (%p1922_p0), %s1794_s25, 512, %s1829_s21, %s668_s12, %s1444_s15, %s1444_s15, %s1445_s26  }
 0x3a4 PF: > { %s714_s4 = sand.u32 1, %s1406_s27   ;;  %p1924_p8 = scmp.ne.s32.totalorder %s1917_s1, 0 }
 0x3a5   : > { %p1925_p9 = scmp.ge.s32.totalorder %s1426_s10, 2  ;;  %s715_s20 = scalar_lea.sflag [#allocation4], %s714_s4 }
 0x3a7   : > { %p1016_p4 = pnand %p1925_p9, %p1924_p8 }
 0x3a9   : > { %1397 = dma.done.wait (!%p1016_p4), %s715_s20, 512  }
 0x3aa   : > { %1399 = vsyncadd (!%p1016_p4), %s715_s20, 4294966784  ;;  %s724_s8 = scalar_lea.sflag [#allocation16], %s714_s4 }
 0x3ab   : > { %1401 = dma.done.wait (!%p1016_p4), %s724_s8, 512  }
 0x3ac   : > { %1403 = vsyncadd (!%p1016_p4), %s724_s8, 4294966784  ;;  %s31_s10 = sadd.s32 1, %s1426_s10   ;;  %s1926_s27 = smov %s1410_s28 }
 0x3ad   : > { %p28_p6 = scmp.ge.s32.totalorder %s31_s10, 4   ;;  %s1927_s28 = smov %s1414_s29 }
 0x3ae   : > { %s1928_s29 = smov %s1697_s23  ;;  %s1929_s30 = smov %s1422_s9 }
 0x3af   : > { %s1930_s9 = smov %s1932_s17  ;;  %30 = sbr.rel (!%p28_p6) target bundleno = 18 (0x12), region = 140 }
 0x3b6   :  { %729 = vsyncpa [#allocation3], 1 }
 0x3b7   :  { %731 = vsyncpa [#allocation3 + $0x1], 1 }
 0x3b8   :  { %732 = vsyncpa [#allocation6], 1 }
 0x3b9   :  { %733 = vsyncpa [#allocation9], 1 }
 0x3ba   :  { %734 = vsyncpa [#allocation12], 1 }
 0x3bb   :  { %735 = vsyncpa [#allocation4], 1 }
 0x3bc   :  { %737 = vsyncpa [#allocation4 + $0x1], 1 }
 0x3bd   :  { %738 = vsyncpa [#allocation16], 1 }
 0x3be   :  { %740 = vsyncpa [#allocation16 + $0x1], 1 }

// kernel: tpu_custom_call.1
= control target key start
LH: loop header
LB: loop body
LE: loop exit
PB: predicated region body
PF: predicated region fallthrough
CT: control target
= control target key end

     0   :  { %s1883_s0 = inlined_call_operand.hbm [shape: f32[2,8,32], index: 0, kind: input, shape index: {}]   ;;  %s1884_s1 = inlined_call_operand.hbm [shape: f32[1,32], index: 1, kind: input, shape index: {}]   ;;  %s1885_s2 = inlined_call_operand.hbm [shape: f32[1,32], index: 2, kind: input, shape index: {}]   ;;  %s1886_s3 = inlined_call_operand.hbm [shape: f32[32,64], index: 3, kind: input, shape index: {}]   ;;  %s1887_s4 = inlined_call_operand.hbm [shape: f32[1,64], index: 4, kind: input, shape index: {}]   ;;  %s1888_s5 = inlined_call_operand.hbm [shape: f32[32,64], index: 5, kind: input, shape index: {}]   ;;  %s1889_s6 = inlined_call_operand.hbm [shape: f32[1,64], index: 6, kind: input, shape index: {}]   ;;  %s1890_s7 = inlined_call_operand.hbm [shape: f32[2,4,8,16], index: 7, kind: output, shape index: {0}]   ;;  %s1891_s8 = inlined_call_operand.hbm [shape: f32[2,4,8,16], index: 8, kind: output, shape index: {1}]  }
   0x1   :  { %1898 = sst [smem:[#allocation23_spill]] %s1883_s0 }
   0x2   :  { %1899 = sst [smem:[#allocation24_spill]] %s1884_s1 }
   0x3   :  { %1900 = sst [smem:[#allocation25_spill]] %s1885_s2 }
   0x4   :  { %1901 = sst [smem:[#allocation26_spill]] %s1886_s3 }
   0x5   :  { %1902 = sst [smem:[#allocation27_spill]] %s1887_s4 }
   0x6   :  { %1903 = sst [smem:[#allocation28_spill]] %s1891_s8 }
   0x7   :  { %14 = vsyncpa [#allocation3], 0 }
   0x8   :  { %16 = vsyncpa [#allocation3 + $0x1], 0 }
   0x9   :  { %17 = vsyncpa [#allocation6], 0 }
   0xa   :  { %18 = vsyncpa [#allocation9], 0 }
   0xb   :  { %19 = vsyncpa [#allocation12], 0 }
   0xc   :  { %20 = vsyncpa [#allocation4], 0 }
   0xd   :  { %22 = vsyncpa [#allocation4 + $0x1], 0 }
   0xe   :  { %23 = vsyncpa [#allocation16], 0 }
   0xf   :  { %25 = vsyncpa [#allocation16 + $0x1], 0  ;;  %s1492_s27 = smov 0   ;;  %s1494_s28 = smov 0  }
  0x10   :  { %s1496_s29 = smov 0   ;;  %s1498_s30 = smov 0  }
  0x11   :  { %s1500_s9 = smov 0   ;;  %s1502_s10 = smov 0  }
  0x12 LB: > { %s1895_s11 = sadd.s32 4294967295, %s1426_s10   ;;  %p876_p0 = scmp.ge.s32.totalorder %s1426_s10, 1  ;;  %s1426_s10 = sphi %s1502_s10, %s31_s10   ;;  %s1422_s9 = sphi %s1500_s9, %s1930_s9   ;;  %s1418_s30 = sphi %s1498_s30, %s1929_s30   ;;  %s1414_s29 = sphi %s1496_s29, %s1928_s29   ;;  %s1410_s28 = sphi %s1494_s28, %s1927_s28   ;;  %s1406_s27 = sphi %s1492_s27, %s1926_s27  }
  0x13   : > { %p1526_p1 = scmp.eq.s32.totalorder %s1895_s11, 0  ;;  %p258_p2 = scmp.lt.s32.totalorder %s1426_s10, 3 }
  0x14   : > { %s1428_s14 = smov [#allocation5]   ;;  %s1429_s16 = smov [#allocation8]  }
  0x15   : > { %s1904_s12 = scalar_select %p1526_p1, 1, 0 }
  0x16   : > { %p1531_p3 = pnand %p876_p0, %p258_p2  ;;  %s271_s15 = sshll.u32 %s1428_s14, 4  ;;  %s272_s15 = int_to_ptr.vmem [resolvable:$true] %s271_s15 }
  0x17   : > { %s292_s17 = sshll.u32 %s1429_s16, 4  ;;  %s1430_s19 = smov [#allocation11]   ;;  %s1544_s17 = int_to_ptr.vmem [resolvable:$true] %s292_s17 }
  0x18   : > { %s1905_s13 = scalar_select %p1531_p3, 1, 0 }
  0x19   : > { %p992_p5 = pneg %p1531_p3  ;;  %s1546_s20 = sshll.u32 %s1430_s19, 4  ;;  %s317_s20 = int_to_ptr.vmem [resolvable:$true] %s1546_s20 }
  0x1a   : > { %s1907_s1 = sld [smem:[#allocation24_spill]] }
  0x1b   : > { %p1540_p6 = pnand %p992_p5, %p1526_p1 }
  0x1d   : > { %p1556_p8 = pneg %p1540_p6 }
  0x20   : > { %s1102_s23 = scalar_lea.hbm %s1907_s1, 16 }
  0x21   : > { %p1103_p7 = scmp.ne.s32.totalorder %s1907_s1, %s1102_s23  ;;  %p1109_p11 = scmp.lt.u32.totalorder %s1102_s23, %s1907_s1 }
  0x23   : > { %p1105_p9 = pnand %p1556_p8, %p1103_p7 }
  0x25   : > { %p1106_p10 = pneg %p1105_p9 }
  0x27   : > { %p1111_p12 = pnand %p1109_p11, %p1106_p10 }
  0x29   : > { %1114 = shalt.err (!%p1111_p12)
}
  0x2a   : > { %s1115_s19 = scalar_lea.vmem %s272_s15, 16  ;;  %s1122_s21 = scalar_lea.vmem %s272_s15, 32 }
  0x2b   : > { %p1116_p13 = scmp.ne.s32.totalorder %s272_s15, %s1115_s19  ;;  %p1123_p5 = scmp.lt.s32.totalorder %s272_s15, %s272_s15 }
  0x2c   : > { %p1124_p4 = scmp.lt.s32.totalorder %s1122_s21, %s1115_s19 }
  0x2d   : > { %p1118_p0 = pnand %p1116_p13, %p1556_p8 }
  0x2e   : > { %p1125_p3 = por %p1124_p4, %p1123_p5 }
  0x2f   : > { %p1119_p2 = pneg %p1118_p0 }
  0x31   : > { %p1126_p1 = pnand %p1125_p3, %p1119_p2 }
  0x33   : > { %1129 = shalt.err (!%p1126_p1)
}
  0x34   : > { %995 = dma.hbm_to_vmem [thread:$0]  (!%p1540_p6), %s1907_s1, 16, %s272_s15, [#allocation6]  }
  0x35   : > { %s1909_s3 = sld [smem:[#allocation26_spill]] }
  0x3b   : > { %s1130_s14 = scalar_lea.hbm %s1909_s3, 512 }
  0x3c   : > { %p1131_p7 = scmp.ne.s32.totalorder %s1909_s3, %s1130_s14  ;;  %p1137_p1 = scmp.lt.u32.totalorder %s1130_s14, %s1909_s3 }
  0x3e   : > { %p1133_p9 = pnand %p1131_p7, %p1556_p8 }
  0x40   : > { %p1134_p4 = pneg %p1133_p9 }
  0x42   : > { %p1139_p3 = pnand %p1137_p1, %p1134_p4 }
  0x44   : > { %1142 = shalt.err (!%p1139_p3)
}
  0x45   : > { %s1143_s15 = scalar_lea.vmem %s1544_s17, 512  ;;  %p1151_p13 = scmp.lt.s32.totalorder %s1544_s17, %s1544_s17 }
  0x46   : > { %p1144_p10 = scmp.ne.s32.totalorder %s1544_s17, %s1143_s15  ;;  %p1152_p0 = scmp.lt.s32.totalorder %s1143_s15, %s1143_s15 }
  0x48   : > { %p1146_p11 = pnand %p1144_p10, %p1556_p8  ;;  %p1153_p2 = por %p1152_p0, %p1151_p13 }
  0x4a   : > { %p1147_p12 = pneg %p1146_p11 }
  0x4c   : > { %p1154_p5 = pnand %p1153_p2, %p1147_p12 }
  0x4e   : > { %1157 = shalt.err (!%p1154_p5)
}
  0x4f   : > { %s1431_s11 = smov 128   ;;  %s1432_s22 = smov 8  }
  0x50   : > { %1001 = dma.hbm_to_vmem [thread:$0]  (!%p1540_p6), %s1909_s3, 512, %s1544_s17, [#allocation9], %s1431_s11, %s1431_s11, %s1432_s22  }
  0x51   : > { %s1158_s16 = scalar_lea.hbm %s1888_s5, 512 }
  0x52   : > { %p1159_p7 = scmp.ne.s32.totalorder %s1888_s5, %s1158_s16  ;;  %p1165_p1 = scmp.lt.u32.totalorder %s1158_s16, %s1888_s5 }
  0x54   : > { %p1161_p9 = pnand %p1159_p7, %p1556_p8 }
  0x56   : > { %p1162_p4 = pneg %p1161_p9 }
  0x58   : > { %p1167_p3 = pnand %p1165_p1, %p1162_p4 }
  0x5a   : > { %1170 = shalt.err (!%p1167_p3)
}
  0x5b   : > { %s1171_s24 = scalar_lea.vmem %s317_s20, 512  ;;  %p1179_p13 = scmp.lt.s32.totalorder %s317_s20, %s317_s20 }
  0x5c   : > { %p1172_p10 = scmp.ne.s32.totalorder %s317_s20, %s1171_s24  ;;  %p1180_p0 = scmp.lt.s32.totalorder %s1171_s24, %s1171_s24 }
  0x5e   : > { %p1174_p11 = pnand %p1172_p10, %p1556_p8  ;;  %p1181_p2 = por %p1180_p0, %p1179_p13 }
  0x60   : > { %p1175_p12 = pneg %p1174_p11 }
  0x62   : > { %p1182_p5 = pnand %p1181_p2, %p1175_p12 }
  0x64   : > { %1185 = shalt.err (!%p1182_p5)
}
  0x65   : > { %1007 = dma.hbm_to_vmem [thread:$0]  (!%p1540_p6), %s1888_s5, 512, %s317_s20, [#allocation12], %s1431_s11, %s1431_s11, %s1432_s22  }
  0x66   : > { %s1433_s1 = smov [#allocation7]   ;;  %s1434_s14 = smov [#allocation10]  }
  0x67   : > { %s282_s25 = sshll.u32 %s1433_s1, 4  ;;  %s306_s16 = sshll.u32 %s1434_s14, 4  ;;  %s283_s25 = int_to_ptr.vmem [resolvable:$true] %s282_s25  ;;  %s307_s16 = int_to_ptr.vmem [resolvable:$true] %s306_s16 }
  0x68   : > { %s1910_s2 = sld [smem:[#allocation25_spill]] }
  0x6e   : > { %s1186_s15 = scalar_lea.hbm %s1910_s2, 16 }
  0x6f   : > { %p1187_p7 = scmp.ne.s32.totalorder %s1910_s2, %s1186_s15  ;;  %p1193_p1 = scmp.lt.u32.totalorder %s1186_s15, %s1910_s2 }
  0x71   : > { %p1189_p9 = pnand %p1187_p7, %p1556_p8 }
  0x73   : > { %p1190_p4 = pneg %p1189_p9 }
  0x75   : > { %p1195_p3 = pnand %p1193_p1, %p1190_p4 }
  0x77   : > { %1198 = shalt.err (!%p1195_p3)
}
  0x78   : > { %s1199_s20 = scalar_lea.vmem %s283_s25, 16  ;;  %s1206_s11 = scalar_lea.vmem %s283_s25, 32 }
  0x79   : > { %p1200_p10 = scmp.ne.s32.totalorder %s283_s25, %s1199_s20  ;;  %p1207_p13 = scmp.lt.s32.totalorder %s283_s25, %s283_s25 }
  0x7a   : > { %p1208_p0 = scmp.lt.s32.totalorder %s1206_s11, %s1199_s20 }
  0x7b   : > { %p1202_p11 = pnand %p1200_p10, %p1556_p8 }
  0x7c   : > { %p1209_p2 = por %p1208_p0, %p1207_p13 }
  0x7d   : > { %p1203_p12 = pneg %p1202_p11 }
  0x7f   : > { %p1210_p5 = pnand %p1209_p2, %p1203_p12 }
  0x81   : > { %1213 = shalt.err (!%p1210_p5)
}
  0x82   : > { %998 = dma.hbm_to_vmem [thread:$0]  (!%p1540_p6), %s1910_s2, 16, %s283_s25, [#allocation6]  }
  0x83   : > { %s1911_s4 = sld [smem:[#allocation27_spill]] }
  0x89   : > { %s1214_s1 = scalar_lea.hbm %s1911_s4, 16 }
  0x8a   : > { %p1215_p7 = scmp.ne.s32.totalorder %s1911_s4, %s1214_s1  ;;  %p1221_p1 = scmp.lt.u32.totalorder %s1214_s1, %s1911_s4 }
  0x8c   : > { %p1217_p9 = pnand %p1215_p7, %p1556_p8 }
  0x8e   : > { %p1218_p4 = pneg %p1217_p9 }
  0x90   : > { %p1223_p3 = pnand %p1221_p1, %p1218_p4 }
  0x92   : > { %1226 = shalt.err (!%p1223_p3)
}
  0x93   : > { %s1227_s24 = scalar_lea.vmem %s307_s16, 16  ;;  %s1234_s25 = scalar_lea.vmem %s307_s16, 32 }
  0x94   : > { %p1228_p10 = scmp.ne.s32.totalorder %s307_s16, %s1227_s24  ;;  %p1235_p13 = scmp.lt.s32.totalorder %s307_s16, %s307_s16 }
  0x95   : > { %p1236_p0 = scmp.lt.s32.totalorder %s1234_s25, %s1227_s24 }
  0x96   : > { %p1230_p11 = pnand %p1228_p10, %p1556_p8 }
  0x97   : > { %p1237_p2 = por %p1236_p0, %p1235_p13 }
  0x98   : > { %p1231_p12 = pneg %p1230_p11 }
  0x9a   : > { %p1238_p5 = pnand %p1237_p2, %p1231_p12 }
  0x9c   : > { %1241 = shalt.err (!%p1238_p5)
}
  0x9d   : > { %1004 = dma.hbm_to_vmem [thread:$0]  (!%p1540_p6), %s1911_s4, 16, %s307_s16, [#allocation9]  }
  0x9e   : > { %s1435_s11 = smov [#allocation13]   ;;  %s1242_s23 = scalar_lea.hbm %s1889_s6, 16 }
  0x9f   : > { %s330_s3 = sshll.u32 %s1435_s11, 4  ;;  %p1243_p7 = scmp.ne.s32.totalorder %s1889_s6, %s1242_s23  ;;  %s331_s3 = int_to_ptr.vmem [resolvable:$true] %s330_s3 }
  0xa0   : > { %p1249_p1 = scmp.lt.u32.totalorder %s1242_s23, %s1889_s6 }
  0xa1   : > { %p1245_p9 = pnand %p1243_p7, %p1556_p8 }
  0xa3   : > { %p1246_p4 = pneg %p1245_p9 }
  0xa5   : > { %p1251_p3 = pnand %p1249_p1, %p1246_p4 }
  0xa7   : > { %1254 = shalt.err (!%p1251_p3)
}
  0xa8   : > { %s1255_s16 = scalar_lea.vmem %s331_s3, 16  ;;  %s1262_s15 = scalar_lea.vmem %s331_s3, 32 }
  0xa9   : > { %p1256_p10 = scmp.ne.s32.totalorder %s331_s3, %s1255_s16  ;;  %p1263_p13 = scmp.lt.s32.totalorder %s331_s3, %s331_s3 }
  0xaa   : > { %p1264_p0 = scmp.lt.s32.totalorder %s1262_s15, %s1255_s16 }
  0xab   : > { %p1258_p11 = pnand %p1256_p10, %p1556_p8 }
  0xac   : > { %p1265_p2 = por %p1264_p0, %p1263_p13 }
  0xad   : > { %p1259_p12 = pneg %p1258_p11 }
  0xaf   : > { %p1266_p5 = pnand %p1265_p2, %p1259_p12 }
  0xb1   : > { %1269 = shalt.err (!%p1266_p5)
}
  0xb2   : > { %1010 = dma.hbm_to_vmem [thread:$0]  (!%p1540_p6), %s1889_s6, 16, %s331_s3, [#allocation12]  }
  0xb3   : > { %s875_s26 = sadd.s32 4294967294, %s1426_s10   ;;  %s43_s17 = sadd.s32 1, %s1422_s9 }
  0xb4   : > { %p45_p8 = scmp.ge.s32.totalorder %s43_s17, 2  ;;  %s52_s18 = sadd.s32 1, %s1414_s29 }
  0xb5   : > { %p59_p7 = scmp.ne.s32.totalorder %s1414_s29, %s1410_s28  ;;  %p60_p9 = scmp.eq.s32.totalorder %s1426_s10, 0 }
  0xb6   : > { %s1932_s17 = smov (%p45_p8, %s43_s17), 0  ;;  %p65_p1 = scmp.ne.s32.totalorder %s1410_s28, %s1406_s27 }
  0xb7   : > { %p1676_p4 = por %p60_p9, %p59_p7  ;;  %s47_s11 = ssub.s32 %s1422_s9, %s1932_s17 }
  0xb8   : > { %s1913_s3 = sadd.s32 4294967295, %s1426_s10   ;;  %p50_p3 = scmp.eq.s32.totalorder %s47_s11, 0 }
  0xb9   : > { %p217_p6 = scmp.eq.s32.totalorder %s1913_s3, 1  ;;  %p1914_p10 = scmp.ne.s32.totalorder %s1904_s12, 0 }
  0xba   : > { %p223_p13 = scmp.eq.s32.totalorder %s875_s26, 1  ;;  %p1028_p2 = scmp.lt.s32.totalorder %s1426_s10, 2 }
  0xbb   : > { %p1688_p11 = por %p1914_p10, %p65_p1  ;;  %p1692_p12 = por %p217_p6, %p59_p7 }
  0xbc   : > { %s1697_s23 = scalar_select %p50_p3, %s1414_s29, %s52_s18  }
  0xbd   : > { %s1916_s8 = scalar_select %p1692_p12, 1, 0 }
  0xbe   : > { %p1699_p0 = por %p223_p13, %p65_p1  ;;  %s341_s14 = sand.u32 1, %s1414_s29  }
  0xbf   : > { %s885_s19 = sshll.u32 %s1422_s9, 7  ;;  %s884_s21 = sshll.u32 %s341_s14, 3 }
  0xc0   : > { %s1917_s1 = scalar_select %p1699_p0, 1, 0 }
  0xc1   : > { %s1918_s0 = sld [smem:[#allocation23_spill]]  ;;  %s345_s25 = scalar_lea.vmem [#allocation2], %s884_s21 }
  0xc2   : > { %s353_s26 = sshll.u32 %s345_s25, 4  ;;  %p1713_p5 = pnand %p1028_p2, %p1676_p4  ;;  %s1717_s26 = int_to_ptr.vmem [resolvable:$true] %s353_s26 }
  0xc3   : > { %s342_s11 = scalar_lea.sflag [#allocation3], %s341_s14 }
  0xc4   : > { %p1272_p7 = pneg %p1713_p5 }
  0xc7   : > { %s1709_s24 = scalar_lea.hbm %s1918_s0, %s885_s19  ;;  %s1275_s20 = scalar_lea.hbm %s1918_s0, 256 }
  0xc8   : > { %s1270_s3 = scalar_lea.hbm %s1709_s24, 128  ;;  %p1276_p4 = scmp.lt.u32.totalorder %s1709_s24, %s1918_s0 }
  0xc9   : > { %p1271_p8 = scmp.ne.s32.totalorder %s1709_s24, %s1270_s3  ;;  %p1277_p6 = scmp.lt.u32.totalorder %s1275_s20, %s1270_s3 }
  0xca   : > { %p1279_p10 = scmp.lt.u32.totalorder %s1270_s3, %s1709_s24 }
  0xcb   : > { %p1273_p9 = pnand %p1272_p7, %p1271_p8  ;;  %p1278_p3 = por %p1277_p6, %p1276_p4 }
  0xcd   : > { %p1274_p1 = pneg %p1273_p9  ;;  %p1280_p13 = por %p1279_p10, %p1278_p3 }
  0xcf   : > { %p1281_p2 = pnand %p1280_p13, %p1274_p1 }
  0xd1   : > { %1284 = shalt.err (!%p1281_p2)
}
  0xd2   : > { %s1285_s14 = scalar_lea.vmem %s1717_s26, 128  ;;  %s1436_s25 = smov [#allocation2]  }
  0xd3   : > { %p1286_p8 = scmp.ne.s32.totalorder %s1717_s26, %s1285_s14  ;;  %s1290_s19 = sshll.u32 %s1436_s25, 4  ;;  %s1291_s19 = int_to_ptr.vmem [resolvable:$false] %s1290_s19 }
  0xd4   : > { %s1292_s21 = scalar_lea.vmem %s1291_s19, 256  ;;  %p1293_p12 = scmp.lt.s32.totalorder %s1717_s26, %s1291_s19 }
  0xd5   : > { %p1288_p9 = pnand %p1286_p8, %p1272_p7  ;;  %p1294_p4 = scmp.lt.s32.totalorder %s1292_s21, %s1285_s14 }
  0xd7   : > { %p1289_p0 = pneg %p1288_p9  ;;  %p1295_p6 = por %p1294_p4, %p1293_p12 }
  0xd9   : > { %p1296_p3 = pnand %p1295_p6, %p1289_p0 }
  0xdb   : > { %1299 = shalt.err (!%p1296_p3)
}
  0xdc   : > { %1014 = dma.hbm_to_vmem [thread:$0]  (!%p1713_p5), %s1709_s24, 128, %s1717_s26, %s342_s11  }
  0xdd   : > { %p1920_p1 = scmp.ne.s32.totalorder %s1905_s13, 0 }
  0xde   : > { %s1747_s3 = sand.u32 (!%p1920_p1), 1, %s1410_s28  }
  0xdf   : > { %362 = sbr.rel (%p1920_p1) target bundleno = 932 (0x3a4), region = 48  ;;  %s887_s20 = sshll.u32 (!%p1920_p1), %s1747_s3, 3 }
  0xe0   : > { %s365_s16 = scalar_lea.sflag (!%p1920_p1), [#allocation3], %s1747_s3  ;;  %s368_s15 = scalar_lea.vmem (!%p1920_p1), [#allocation2], %s887_s20 }
  0xe6   : > { %1381 = dma.done.wait (%p1688_p11), %s365_s16, 128  }
  0xe7   : > { %1383 = vsyncadd (%p1688_p11), %s365_s16, 4294967168  ;;  %p1921_p12 = scmp.ne.s32.totalorder %s1904_s12, 0 }
  0xe9   : > { %1385 = dma.done.wait (%p1921_p12), [#allocation6], 32  }
  0xea   : > { %1387 = vsyncadd (%p1921_p12), [#allocation6], 4294967264 }
  0xeb   : > { %1389 = dma.done.wait (%p1921_p12), [#allocation9], 528  }
  0xec   : > { %1391 = vsyncadd (%p1921_p12), [#allocation9], 4294966768 }
  0xed   : > { %1393 = dma.done.wait (%p1921_p12), [#allocation12], 528  }
  0xee   : > { %1395 = vsyncadd (%p1921_p12), [#allocation12], 4294966768  ;;  %vm433_vm0 = vcmask 261120   ;;  %v430_v0 = vld [vmem:[%s368_s15] sm:$0xff]  ;;  %v462_v7 = vld [vmem:[#allocation8] sm:$0xff]  ;;  %v1437_v10 = vmov 0.0|0.0  }
  0xef   : > { %v434_v1 = vsel %vm433_vm0, %v430_v0, 0.0  ;;  %v463_v8 = vld [vmem:[#allocation8 + $0x8] sm:$0xff]  ;;  %950 = vmatprep.subr.bf16.mxu0 %v1437_v10  ;;  %956 = vmatprep.subr.bf16.mxu1 %v1437_v10  ;;  %v464_v13 = vld [vmem:[#allocation8 + $0x10] sm:$0xff]  ;;  %v465_v14 = vld [vmem:[#allocation8 + $0x18] sm:$0xff]  ;;  %vm1438_vm1 = vmmov 0   ;;  %v1439_v18 = vmov 0.0  }
  0xf0   : > { %435 = vadd.xlane.f32.xlu0 %v434_v1  ;;  %v546_v9 = vld [vmem:[#allocation11] sm:$0xff]  ;;  %v951_v11 = vpack.c.bf16 %v463_v8, %v462_v7  ;;  %v547_v12 = vld [vmem:[#allocation11 + $0x8] sm:$0xff]  ;;  %v548_v16 = vld [vmem:[#allocation11 + $0x10] sm:$0xff]  ;;  %936 = vmatprep.mubr.msk.f32.mxu0 %vm1438_vm1, %v1439_v18  ;;  %v954_v19 = vpack.c.bf16 %v465_v14, %v464_v13  ;;  %s894_s12 = sshll.u32 %s1747_s3, 5  ;;  %vm627_vm2 = vcmask 130048   ;;  %s1440_s24 = smov 96  }
  0xf1   : > { %v957_v15 = vpack.c.bf16 %v547_v12, %v546_v9  ;;  %v549_v17 = vld [vmem:[#allocation11 + $0x18] sm:$0xff]  ;;  %947 = vmatprep.mubr.msk.f32.mxu1 %vm1438_vm1, %v1439_v18  ;;  %v900_v31 = vld [vmem:[#allocation13] ss:$0 sm:$0xff]  ;;  %s422_s13 = scalar_lea.vmem [#allocation14], %s894_s12  ;;  %s1773_s22 = scalar_lea.vmem [#allocation15], %s894_s12 }
  0xf2   : > { %952 = vmatpush3.bf16.msra.mxu0 %v951_v11  ;;  %v960_v20 = vpack.c.bf16 %v549_v17, %v548_v16  ;;  %v896_v25 = vld [vmem:[#allocation5] ss:$0 sm:$0xff]  ;;  %v897_v27 = vld [vmem:[#allocation7] ss:$0 sm:$0xff]  ;;  %v898_v30 = vld [vmem:[#allocation10] ss:$0 sm:$0xff] }
  0xf3   : > { %958 = vmatpush3.bf16.msra.mxu1 %v957_v15  ;;  %953 = vmatprep.subr.bf16.mxu0 %v1437_v10  ;;  %s1441_s26 = smov 112   ;;  %s1442_s18 = smov 80  }
  0xf4   : > { %959 = vmatprep.subr.bf16.mxu1 %v1437_v10  ;;  %s682_s11 = sshll.u32 %s422_s13, 4  ;;  %s916_s14 = sshll.u32 %s1418_s30, 9  ;;  %s1782_s11 = int_to_ptr.vmem [resolvable:$true] %s682_s11 }
  0xf5   : > { %s699_s25 = sshll.u32 %s1773_s22, 4  ;;  %s1792_s20 = scalar_lea.hbm %s1890_s7, %s916_s14  ;;  %s1794_s25 = int_to_ptr.vmem [resolvable:$true] %s699_s25 }
  0xf6   : > { %955 = vmatpush3.bf16.msra.mxu0 %v954_v19  ;;  %s663_s16 = scalar_lea.sflag [#allocation4], %s1747_s3  ;;  %s1300_s15 = scalar_lea.vmem %s1782_s11, 512 }
  0xf7   : > { %961 = vmatpush3.bf16.msra.mxu1 %v960_v20  ;;  %p1301_p11 = scmp.ne.s32.totalorder %s1782_s11, %s1300_s15  ;;  %p1922_p0 = scmp.ne.s32.totalorder %s1916_s8, 0 }
  0xf8   : > { %s1443_s12 = smov [#allocation14]  }
  0xf9   : > { %p1302_p5 = pnand %p1301_p11, %p1922_p0 }
  0xfb   : > { %p1303_p7 = pneg %p1302_p5 }
 0x17d   : > { %v436_v2 = vpop.xlane.xlu0 %435 }
 0x17e   : > { %v438_v3 = vmul.f32 0.03125, %v436_v2 }
 0x180   : > { %v439_v4 = vsub.f32 %v430_v0, %v438_v3 }
 0x182   : > { %v440_v5 = vmul.f32 %v439_v4, %v439_v4 }
 0x184   : > { %v441_v6 = vsel %vm433_vm0, %v440_v5, 0.0 }
 0x185   : > { %442 = vadd.xlane.f32.xlu0 %v441_v6 }
 0x212   : > { %v443_v21 = vpop.xlane.xlu0 %442 }
 0x213   : > { %v444_v22 = vmul.f32 0.03125, %v443_v21 }
 0x215   : > { %v445_v23 = vadd.f32 1e-05, %v444_v22 }
 0x217   : > { %1100 = vrsqrt.f32 %v445_v23 }
 0x221   : > { %v1101_v24 = vpop.eup %1100 }
 0x222   : > { %v447_v26 = vmul.f32 %v1101_v24, %v439_v4 }
 0x224   : > { %v454_v28 = vmul.f32 %v896_v25, %v447_v26 }
 0x226   : > { %v461_v29 = vadd.f32 %v897_v27, %v454_v28 }
 0x228   : > { %937 = vmatmul.mubr.msk.f32.vlgmr.msra.gmra.mrb[0].mxu0 %vm433_vm0, %v461_v29  ;;  %948 = vmatmul.mubr.msk.f32.vlgmr.msra.gmra.mrb[0].mxu1 %vm433_vm0, %v461_v29 }
 0x2fb   : > { %v542_v32 = vpop.f32.mrb[0].mxu0  ;;  %v623_v33 = vpop.f32.mrb[0].mxu1 }
 0x2fc   : > { %v543_v34 = vadd.f32 %v898_v30, %v542_v32  ;;  %v624_v35 = vadd.f32 %v900_v31, %v623_v33  ;;  %v938_v36 = vpop.f32.mrb[1].mxu0  ;;  %v949_v37 = vpop.f32.mrb[1].mxu1 }
 0x2fe   : > { %628 = vst.msk [vmem:[%s422_s13] sm:$0xff] %vm627_vm2, %v543_v34  ;;  %629 = vst.msk [vmem:[%s1773_s22] sm:$0xff] %vm627_vm2, %v624_v35  ;;  %642 = vrot.lane.b32.xlu0 %v543_v34, %s1440_s24  ;;  %631 = vrot.lane.b32.xlu1 %v543_v34, %s1441_s26 }
 0x302   : > { %637 = vrot.lane.b32.xlu1 %v624_v35, %s1441_s26 }
 0x306   : > { %647 = vrot.lane.b32.xlu1 %v624_v35, %s1440_s24  ;;  %s1304_s24 = sshll.u32 %s1443_s12, 4  ;;  %s1305_s24 = int_to_ptr.vmem [resolvable:$false] %s1304_s24 }
 0x307   : > { %s1306_s26 = scalar_lea.vmem %s1305_s24, 1024  ;;  %p1307_p10 = scmp.lt.s32.totalorder %s1782_s11, %s1305_s24 }
 0x308   : > { %p1308_p13 = scmp.lt.s32.totalorder %s1306_s26, %s1300_s15 }
 0x30a   : > { %652 = vrot.lane.b32.xlu1 %v543_v34, %s1442_s18  ;;  %p1309_p2 = por %p1308_p13, %p1307_p10 }
 0x30c   : > { %p1310_p8 = pnand %p1309_p2, %p1303_p7 }
 0x30e   : > { %657 = vrot.lane.b32.xlu1 %v624_v35, %s1442_s18 }
 0x370   : > { %v643_v38 = vpop.permute.xlu0 %642  ;;  %v632_v39 = vpop.permute.xlu1 %631 }
 0x371   : > { %904 = vst.msk [vmem:[%s422_s13 + $0x10] sm:$0xff] %vm627_vm2, %v643_v38  ;;  %902 = vst.msk [vmem:[%s422_s13 + $0x8] sm:$0xff] %vm627_vm2, %v632_v39 }
 0x374   : > { %v638_v40 = vpop.permute.xlu1 %637 }
 0x375   : > { %903 = vst.msk [vmem:[%s1773_s22 + $0x8] sm:$0xff] %vm627_vm2, %v638_v40 }
 0x378   : > { %v648_v41 = vpop.permute.xlu1 %647 }
 0x379   : > { %905 = vst.msk [vmem:[%s1773_s22 + $0x10] sm:$0xff] %vm627_vm2, %v648_v41 }
 0x37c   : > { %v653_v42 = vpop.permute.xlu1 %652 }
 0x37d   : > { %906 = vst.msk [vmem:[%s422_s13 + $0x18] sm:$0xff] %vm627_vm2, %v653_v42 }
 0x37e   : > { %1313 = shalt.err (!%p1310_p8)
}
 0x37f   : > { %s1314_s13 = scalar_lea.hbm %s1792_s20, 512  ;;  %s1318_s21 = scalar_lea.hbm %s1890_s7, 1024 }
 0x380   : > { %p1315_p9 = scmp.ne.s32.totalorder %s1792_s20, %s1314_s13  ;;  %p1319_p3 = scmp.lt.u32.totalorder %s1792_s20, %s1890_s7 }
 0x381   : > { %p1320_p1 = scmp.lt.u32.totalorder %s1318_s21, %s1314_s13  ;;  %p1322_p11 = scmp.lt.u32.totalorder %s1314_s13, %s1792_s20 }
 0x382   : > { %p1316_p4 = pnand %p1315_p9, %p1922_p0 }
 0x383   : > { %p1321_p12 = por %p1320_p1, %p1319_p3 }
 0x384   : > { %p1317_p6 = pneg %p1316_p4 }
 0x385   : > { %p1323_p5 = por %p1322_p11, %p1321_p12 }
 0x387   : > { %p1324_p7 = pnand %p1323_p5, %p1317_p6 }
 0x389   : > { %1327 = shalt.err (!%p1324_p7)
}
 0x38a   : > { %s1444_s15 = smov 128   ;;  %s1445_s26 = smov 8   ;;  %v658_v43 = vpop.permute.xlu1 %657 }
 0x38b   : > { %988 = dma.vmem_to_hbm [thread:$0]  (%p1922_p0), %s1782_s11, 512, %s1792_s20, %s663_s16, %s1444_s15, %s1444_s15, %s1445_s26  }
 0x38c   : > { %s1923_s19 = sld [smem:[#allocation28_spill]]  ;;  %907 = vst.msk [vmem:[%s1773_s22 + $0x18] sm:$0xff] %vm627_vm2, %v658_v43  ;;  %s668_s12 = scalar_lea.sflag [#allocation16], %s1747_s3 }
 0x38d   : > { %s1328_s24 = scalar_lea.vmem %s1794_s25, 512  ;;  %s1446_s0 = smov [#allocation15]  }
 0x38e   : > { %p1329_p10 = scmp.ne.s32.totalorder %s1794_s25, %s1328_s24  ;;  %s1332_s2 = sshll.u32 %s1446_s0, 4  ;;  %s1333_s2 = int_to_ptr.vmem [resolvable:$false] %s1332_s2 }
 0x38f   : > { %s1334_s4 = scalar_lea.vmem %s1333_s2, 1024  ;;  %p1335_p8 = scmp.lt.s32.totalorder %s1794_s25, %s1333_s2 }
 0x390   : > { %p1330_p13 = pnand %p1329_p10, %p1922_p0  ;;  %p1336_p9 = scmp.lt.s32.totalorder %s1334_s4, %s1328_s24 }
 0x392   : > { %s1829_s21 = scalar_lea.hbm %s1923_s19, %s916_s14  ;;  %p1331_p2 = pneg %p1330_p13 }
 0x393   : > { %p1337_p4 = por %p1336_p9, %p1335_p8 }
 0x395   : > { %p1338_p6 = pnand %p1337_p4, %p1331_p2 }
 0x397   : > { %1341 = shalt.err (!%p1338_p6)
}
 0x398   : > { %s1342_s30 = scalar_lea.hbm %s1829_s21, 512  ;;  %s1346_s0 = scalar_lea.hbm %s1923_s19, 1024 }
 0x399   : > { %p1343_p3 = scmp.ne.s32.totalorder %s1829_s21, %s1342_s30  ;;  %p1347_p11 = scmp.lt.u32.totalorder %s1829_s21, %s1923_s19 }
 0x39a   : > { %p1348_p5 = scmp.lt.u32.totalorder %s1346_s0, %s1342_s30  ;;  %p1350_p10 = scmp.lt.u32.totalorder %s1342_s30, %s1829_s21 }
 0x39b   : > { %p1344_p1 = pnand %p1343_p3, %p1922_p0 }
 0x39c   : > { %p1349_p7 = por %p1348_p5, %p1347_p11 }
 0x39d   : > { %p1345_p12 = pneg %p1344_p1 }
 0x39e   : > { %p1351_p13 = por %p1350_p10, %p1349_p7 }
 0x3a0   : > { %p1352_p2 = pnand %p1351_p13, %p1345_p12 }
 0x3a2   : > { %1355 = shalt.err (!%p1352_p2)
}
 0x3a3   : > { %989 = dma.vmem_to_hbm [thread:$0]  (%p1922_p0), %s1794_s25, 512, %s1829_s21, %s668_s12, %s1444_s15, %s1444_s15, %s1445_s26  }
 0x3a4 PF: > { %s714_s4 = sand.u32 1, %s1406_s27   ;;  %p1924_p8 = scmp.ne.s32.totalorder %s1917_s1, 0 }
 0x3a5   : > { %p1925_p9 = scmp.ge.s32.totalorder %s1426_s10, 2  ;;  %s715_s20 = scalar_lea.sflag [#allocation4], %s714_s4 }
 0x3a7   : > { %p1016_p4 = pnand %p1925_p9, %p1924_p8 }
 0x3a9   : > { %1397 = dma.done.wait (!%p1016_p4), %s715_s20, 512  }
 0x3aa   : > { %1399 = vsyncadd (!%p1016_p4), %s715_s20, 4294966784  ;;  %s724_s8 = scalar_lea.sflag [#allocation16], %s714_s4 }
 0x3ab   : > { %1401 = dma.done.wait (!%p1016_p4), %s724_s8, 512  }
 0x3ac   : > { %1403 = vsyncadd (!%p1016_p4), %s724_s8, 4294966784  ;;  %s31_s10 = sadd.s32 1, %s1426_s10   ;;  %s1926_s27 = smov %s1410_s28 }
 0x3ad   : > { %p28_p6 = scmp.ge.s32.totalorder %s31_s10, 4   ;;  %s1927_s28 = smov %s1414_s29 }
 0x3ae   : > { %s1928_s29 = smov %s1697_s23  ;;  %s1929_s30 = smov %s1422_s9 }
 0x3af   : > { %s1930_s9 = smov %s1932_s17  ;;  %30 = sbr.rel (!%p28_p6) target bundleno = 18 (0x12), region = 140 }
 0x3b6   :  { %729 = vsyncpa [#allocation3], 1 }
 0x3b7   :  { %731 = vsyncpa [#allocation3 + $0x1], 1 }
 0x3b8   :  { %732 = vsyncpa [#allocation6], 1 }
 0x3b9   :  { %733 = vsyncpa [#allocation9], 1 }
 0x3ba   :  { %734 = vsyncpa [#allocation12], 1 }
 0x3bb   :  { %735 = vsyncpa [#allocation4], 1 }
 0x3bc   :  { %737 = vsyncpa [#allocation4 + $0x1], 1 }
 0x3bd   :  { %738 = vsyncpa [#allocation16], 1 }
 0x3be   :  { %740 = vsyncpa [#allocation16 + $0x1], 1 }

</bundles_post_ra>
